<compile_context>
chip_gen: v6e
topology: v6e:2x2x1
jax: 0.10.0
libtpu: 0.0.40
codegen_flags: <defaults>
</compile_context>

<pallas_src>
import jax
import jax.numpy as jnp
from jax import lax
from jax.experimental import pallas as pl
from jax.experimental.pallas import tpu as pltpu

KSIZE = 7
PAD = 3
KK = KSIZE * KSIZE

_VMEM_BUDGET = 10 << 20   # conservative: fits every generation's default scoped VMEM


def _round_up(x, m):
    return ((x + m - 1) // m) * m


def _divisors(n):
    return [d for d in range(1, n + 1) if n % d == 0]


def _tree_sum(vals):
    vals = list(vals)
    while len(vals) > 1:
        nxt = [vals[i] + vals[i + 1] for i in range(0, len(vals) - 1, 2)]
        if len(vals) % 2:
            nxt.append(vals[-1])
        vals = nxt
    return vals[0]


def _plan_bytes(Nb, Cb, HW, L, in_itemsize, out_itemsize):
    """VMEM footprint estimate including (8,128) tile padding, double
    buffering of the auto-pipelined blocks, the output block and scratch."""
    lane = _round_up(HW, 128)
    x_blk = Nb * _round_up(Cb, 8) * lane * in_itemsize * 2   # double-buffered input
    o_blk = Nb * 8 * lane * out_itemsize * 2                 # (Nb,1,HW): 1 pads to 8 sublanes
    scratch = 2 * _round_up(Nb, 8) * L * 4                   # two f32 conv/carry buffers
    return x_blk + o_blk + scratch


def _pick_blocks(N, C, HW, L, in_itemsize, out_itemsize,
                 batch_block=None, channel_block=None):
    multicore = False
    try:
        multicore = "v7" in jax.devices()[0].device_kind.lower()
    except Exception:
        pass

    if channel_block is None:
        fits = [d for d in _divisors(C)
                if _plan_bytes(1, d, HW, L, in_itemsize, out_itemsize) <= _VMEM_BUDGET]
        channel_block = max(fits) if fits else 1
    Cb = channel_block

    if batch_block is None:
        cand = [d for d in _divisors(N)
                if _plan_bytes(d, Cb, HW, L, in_itemsize, out_itemsize) <= _VMEM_BUDGET]
        if not cand:
            cand = [1]
        if multicore:
            # v7x: two TensorCores share the "parallel" batch axis -> prefer
            # >= 2 (ideally an even number of) batch steps.  On v5e/v6e a
            # 1-step grid with the largest block is best, so no preference.
            even = [d for d in cand if (N // d) >= 2 and (N // d) % 2 == 0]
            two = [d for d in cand if (N // d) >= 2]
            cand = even or two or cand
        batch_block = max(cand)
    Nb = batch_block

    assert N % Nb == 0 and C % Cb == 0, (N, Nb, C, Cb)
    return Nb, Cb


def _make_kernel(Nb, H, W, D, L):
    HW = H * W

    def kernel(x_ref, w_ref, o_ref, abuf, mbuf):
        # x_ref: (Nb, Cb, HW) VMEM lane-dense channel block
        # w_ref: (98,) SMEM: [0:49] avg-plane taps (pre-scaled by 1/C), [49:98] max taps
        # o_ref: (Nb, 1, HW) VMEM
        # abuf/mbuf: (Nb, L) f32 VMEM; lanes [D, D+HW) carry the channel
        #   sum / max of the flattened plane, the rest is the conv zero halo.
        c_step = pl.program_id(1)
        n_csteps = pl.num_programs(1)

        # --- Vectorized channel reduction (no serial per-channel chain). ---
        # TODO(synk): for bf16 inputs on v6e/v7x the running max could stay in
        # bf16 (halves vreg/VALU traffic); kept in f32 for simplicity and v5e.
        xf = x_ref[...].astype(jnp.float32)
        part_sum = jnp.sum(xf, axis=1)          # (Nb, HW)
        part_max = jnp.max(xf, axis=1)          # (Nb, HW)

        @pl.when(c_step == 0)
        def _init():
            abuf[:, D:D + HW] = part_sum
            mbuf[:, D:D + HW] = part_max

        @pl.when(c_step > 0)
        def _accumulate():
            abuf[:, D:D + HW] += part_sum
            mbuf[:, D:D + HW] = jnp.maximum(mbuf[:, D:D + HW], part_max)

        @pl.when(c_step == n_csteps - 1)
        def _finalize():
            # Zero only the halo lanes; the interior was just (over)written.
            zl = jnp.zeros((Nb, D), jnp.float32)
            zr = jnp.zeros((Nb, L - D - HW), jnp.float32)
            abuf[:, 0:D] = zl
            abuf[:, D + HW:L] = zr
            mbuf[:, 0:D] = zl
            mbuf[:, D + HW:L] = zr

            # Hoist all 98 SMEM scalar weight reads out of the tap loops.
            wa = [w_ref[t] for t in range(KK)]
            wm = [w_ref[KK + t] for t in range(KK)]

            # Column coordinate of every output lane (row-major h*W + w).
            col = lax.broadcasted_iota(jnp.int32, (Nb, HW), 1) % W

            # 7x7 "same" conv in the flattened lane domain:
            #   out[p] = sum_{dy,dx} w[dy,dx] * buf[D + p + (dy-PAD)*W + (dx-PAD)]
            # Vertical zero padding comes from the buffer halos; horizontal
            # zero padding is one static mask per dx.  Per-dx partials are
            # tree-summed (ILP, no 98-deep accumulator chain).
            partials = []
            for dx in range(KSIZE):
                valid = (col >= PAD - dx) & (col < W + PAD - dx)
                terms = []
                for dy in range(KSIZE):
                    s = D + (dy - PAD) * W + (dx - PAD)   # static lane shift
                    sa = abuf[:, s:s + HW]
                    sm = mbuf[:, s:s + HW]
                    t = dy * KSIZE + dx
                    terms.append(wa[t] * sa + wm[t] * sm)
                partials.append(jnp.where(valid, _tree_sum(terms), 0.0))
            acc = _tree_sum(partials)                     # (Nb, HW) f32

            # Lane-dense (HW = multiple of 128) unmasked store.
            o_ref[:, 0] = jax.nn.sigmoid(acc).astype(o_ref.dtype)

    return kernel


def spatial_attention(x, weight, *, batch_block=None, channel_block=None):
    """x: (N, C, H, W); weight: (1, 2, 7, 7) -> (N, 1, H, W)."""
    N, C, H, W = x.shape
    HW = H * W

    # Conv buffer geometry: data at lanes [D, D+HW), zero halo of >= PAD*(W+1)
    # lanes on each side so every (dy,dx) tap is a static in-bounds lane shift.
    halo = PAD * (W + 1)
    D = _round_up(halo, 128)
    L = _round_up(D + HW + halo, 128)

    # Flatten the conv weight to (98,) and fold 1/C into the avg-plane taps
    # (the kernel convolves the raw channel sum).
    w2 = weight.astype(jnp.float32).reshape(2, KK)
    w_flat = jnp.concatenate([w2[0] * (1.0 / C), w2[1]], axis=0)

    Nb, Cb = _pick_blocks(N, C, HW, L, x.dtype.itemsize, x.dtype.itemsize,
                          batch_block, channel_block)

    x_flat = x.reshape(N, C, HW)          # free metadata reshape (contiguous NCHW)

    grid_spec = pltpu.PrefetchScalarGridSpec(
        num_scalar_prefetch=0,
        grid=(N // Nb, C // Cb),          # reduction (channel) axis last
        in_specs=[
            pl.BlockSpec((Nb, Cb, HW), lambda n, c: (n, c, 0)),
            pl.BlockSpec(memory_space=pltpu.MemorySpace.SMEM),
        ],
        out_specs=pl.BlockSpec((Nb, 1, HW), lambda n, c: (n, 0, 0)),
        scratch_shapes=[pltpu.VMEM((Nb, L), jnp.float32),
                        pltpu.VMEM((Nb, L), jnp.float32)],
    )

    plan = _plan_bytes(Nb, Cb, HW, L, x.dtype.itemsize, x.dtype.itemsize)
    extra = {}
    if plan > (12 << 20):
        # Only raise the scoped-VMEM limit when actually needed; capped well
        # below v7x's 64 MiB physical VMEM.
        extra["vmem_limit_bytes"] = int(min(plan + (8 << 20), 56 << 20))

    out_flat = pl.pallas_call(
        _make_kernel(Nb, H, W, D, L),
        out_shape=jax.ShapeDtypeStruct((N, 1, HW), x.dtype),
        grid_spec=grid_spec,
        compiler_params=pltpu.CompilerParams(
            dimension_semantics=("parallel", "arbitrary"), **extra),
    )(x_flat, w_flat)

    return out_flat.reshape(N, 1, H, W)   # free metadata reshape back to NCHW


def spatial_attention_ref(x, weight):
    """Pure-JAX reference matching the PyTorch forward."""
    avg = jnp.mean(x, axis=1, keepdims=True)
    mx = jnp.max(x, axis=1, keepdims=True)
    cat = jnp.concatenate([avg, mx], axis=1)
    y = lax.conv_general_dilated(
        cat, weight, window_strides=(1, 1),
        padding=((PAD, PAD), (PAD, PAD)),
        dimension_numbers=("NCHW", "OIHW", "NCHW"))
    return jax.nn.sigmoid(y)


if __name__ == "__main__":
    key = jax.random.PRNGKey(0)
    kx, kw = jax.random.split(key)

    # Small shapes consistent with the module: batch=2, channels=4, 16x16 spatial.
    x = jax.random.normal(kx, (2, 4, 16, 16), dtype=jnp.float32)
    # Deterministic synthetic conv1 weight: Conv2d(2, 1, kernel_size=7, bias=False)
    weight = jax.random.normal(kw, (1, 2, KSIZE, KSIZE), dtype=jnp.float32) * 0.05

    out = spatial_attention(x, weight)
    out = jax.block_until_ready(out)

    ref = spatial_attention_ref(x, weight)
    assert out.shape == (2, 1, 16, 16)
    assert jnp.allclose(out, ref, atol=1e-5, rtol=1e-5), "mismatch vs reference"

    print("KERNEL_OK")
</pallas_src>

<mosaic_0001>
module attributes {stable_mosaic.version = 11 : i64} {
  func.func @kernel(%arg0: i32, %arg1: i32, %arg2: memref<2x4x256xf32, #tpu.memory_space<vmem>>, %arg3: memref<98xf32, #tpu.memory_space<smem>>, %arg4: memref<2x1x256xf32, #tpu.memory_space<vmem>>, %arg5: memref<2x512xf32, #tpu.memory_space<vmem>>, %arg6: memref<2x512xf32, #tpu.memory_space<vmem>>) attributes {dimension_semantics = [#tpu.dimension_semantics<parallel>, #tpu.dimension_semantics<arbitrary>], iteration_bounds = array<i64: 1, 1>, scalar_prefetch = 0 : i64, scratch_operands = 2 : i64, tpu.core_type = #tpu.core_type<tc>, window_params = [{transform_indices = @transform_0, window_bounds = array<i64: 2, 4, 256>}, {transform_indices = @transform_1, window_bounds = array<i64: 98>}, {transform_indices = @transform_2, window_bounds = array<i64: 2, 1, 256>}]} {
    %c0 = arith.constant 0 : index
    %c0_0 = arith.constant 0 : index
    %c0_1 = arith.constant 0 : index
    %0 = vector.load %arg2[%c0, %c0_0, %c0_1] : memref<2x4x256xf32, #tpu.memory_space<vmem>>, vector<2x4x256xf32>
    %cst = arith.constant dense<0.000000e+00> : vector<2x256xf32>
    %1 = vector.multi_reduction <add>, %0, %cst [1] : vector<2x4x256xf32> to vector<2x256xf32>
    %cst_2 = arith.constant dense<0xFF800000> : vector<2x256xf32>
    %2 = vector.multi_reduction <maximumf>, %0, %cst_2 [1] : vector<2x4x256xf32> to vector<2x256xf32>
    %c0_i32 = arith.constant 0 : i32
    %3 = arith.cmpi eq, %arg1, %c0_i32 : i32
    %4 = arith.extui %3 : i1 to i32
    %c0_i32_3 = arith.constant 0 : i32
    %5 = arith.cmpi ne, %4, %c0_i32_3 : i32
    scf.if %5 {
      %c0_8 = arith.constant 0 : index
      %c128 = arith.constant 128 : index
      %12 = vector.load %arg5[%c0_8, %c128] : memref<2x512xf32, #tpu.memory_space<vmem>>, vector<2x256xf32>
      tpu.vector_store %arg5[%c0_8, %c128], %1 {strides = array<i32>} : memref<2x512xf32, #tpu.memory_space<vmem>>, vector<2x256xf32>,
      %c0_9 = arith.constant 0 : index
      %c128_10 = arith.constant 128 : index
      %13 = vector.load %arg6[%c0_9, %c128_10] : memref<2x512xf32, #tpu.memory_space<vmem>>, vector<2x256xf32>
      tpu.vector_store %arg6[%c0_9, %c128_10], %2 {strides = array<i32>} : memref<2x512xf32, #tpu.memory_space<vmem>>, vector<2x256xf32>,
    } else {
    }
    %c0_i32_4 = arith.constant 0 : i32
    %6 = arith.cmpi sgt, %arg1, %c0_i32_4 : i32
    %7 = arith.extui %6 : i1 to i32
    %c0_i32_5 = arith.constant 0 : i32
    %8 = arith.cmpi ne, %7, %c0_i32_5 : i32
    scf.if %8 {
      %c0_8 = arith.constant 0 : index
      %c128 = arith.constant 128 : index
      %12 = vector.load %arg5[%c0_8, %c128] : memref<2x512xf32, #tpu.memory_space<vmem>>, vector<2x256xf32>
      %13 = arith.addf %12, %1 : vector<2x256xf32>
      %c0_9 = arith.constant 0 : index
      %c128_10 = arith.constant 128 : index
      %14 = vector.load %arg5[%c0_9, %c128_10] : memref<2x512xf32, #tpu.memory_space<vmem>>, vector<2x256xf32>
      tpu.vector_store %arg5[%c0_9, %c128_10], %13 {strides = array<i32>} : memref<2x512xf32, #tpu.memory_space<vmem>>, vector<2x256xf32>,
      %c0_11 = arith.constant 0 : index
      %c128_12 = arith.constant 128 : index
      %15 = vector.load %arg6[%c0_11, %c128_12] : memref<2x512xf32, #tpu.memory_space<vmem>>, vector<2x256xf32>
      %16 = arith.maximumf %15, %2 : vector<2x256xf32>
      %c0_13 = arith.constant 0 : index
      %c128_14 = arith.constant 128 : index
      %17 = vector.load %arg6[%c0_13, %c128_14] : memref<2x512xf32, #tpu.memory_space<vmem>>, vector<2x256xf32>
      tpu.vector_store %arg6[%c0_13, %c128_14], %16 {strides = array<i32>} : memref<2x512xf32, #tpu.memory_space<vmem>>, vector<2x256xf32>,
    } else {
    }
    %c0_i32_6 = arith.constant 0 : i32
    %9 = arith.cmpi eq, %arg1, %c0_i32_6 : i32
    %10 = arith.extui %9 : i1 to i32
    %c0_i32_7 = arith.constant 0 : i32
    %11 = arith.cmpi ne, %10, %c0_i32_7 : i32
    scf.if %11 {
      %cst_8 = arith.constant 0.000000e+00 : f32
      %12 = vector.broadcast %cst_8 : f32 to vector<2x128xf32>
      %cst_9 = arith.constant 0.000000e+00 : f32
      %13 = vector.broadcast %cst_9 : f32 to vector<2x128xf32>
      %c0_10 = arith.constant 0 : index
      %c0_11 = arith.constant 0 : index
      %14 = vector.load %arg5[%c0_10, %c0_11] : memref<2x512xf32, #tpu.memory_space<vmem>>, vector<2x128xf32>
      tpu.vector_store %arg5[%c0_10, %c0_11], %12 {strides = array<i32>} : memref<2x512xf32, #tpu.memory_space<vmem>>, vector<2x128xf32>,
      %c0_12 = arith.constant 0 : index
      %c384 = arith.constant 384 : index
      %15 = vector.load %arg5[%c0_12, %c384] : memref<2x512xf32, #tpu.memory_space<vmem>>, vector<2x128xf32>
      tpu.vector_store %arg5[%c0_12, %c384], %13 {strides = array<i32>} : memref<2x512xf32, #tpu.memory_space<vmem>>, vector<2x128xf32>,
      %c0_13 = arith.constant 0 : index
      %c0_14 = arith.constant 0 : index
      %16 = vector.load %arg6[%c0_13, %c0_14] : memref<2x512xf32, #tpu.memory_space<vmem>>, vector<2x128xf32>
      tpu.vector_store %arg6[%c0_13, %c0_14], %12 {strides = array<i32>} : memref<2x512xf32, #tpu.memory_space<vmem>>, vector<2x128xf32>,
      %c0_15 = arith.constant 0 : index
      %c384_16 = arith.constant 384 : index
      %17 = vector.load %arg6[%c0_15, %c384_16] : memref<2x512xf32, #tpu.memory_space<vmem>>, vector<2x128xf32>
      tpu.vector_store %arg6[%c0_15, %c384_16], %13 {strides = array<i32>} : memref<2x512xf32, #tpu.memory_space<vmem>>, vector<2x128xf32>,
      %c0_17 = arith.constant 0 : index
      %18 = memref.load %arg3[%c0_17] : memref<98xf32, #tpu.memory_space<smem>>
      %c1 = arith.constant 1 : index
      %19 = memref.load %arg3[%c1] : memref<98xf32, #tpu.memory_space<smem>>
      %c2 = arith.constant 2 : index
      %20 = memref.load %arg3[%c2] : memref<98xf32, #tpu.memory_space<smem>>
      %c3 = arith.constant 3 : index
      %21 = memref.load %arg3[%c3] : memref<98xf32, #tpu.memory_space<smem>>
      %c4 = arith.constant 4 : index
      %22 = memref.load %arg3[%c4] : memref<98xf32, #tpu.memory_space<smem>>
      %c5 = arith.constant 5 : index
      %23 = memref.load %arg3[%c5] : memref<98xf32, #tpu.memory_space<smem>>
      %c6 = arith.constant 6 : index
      %24 = memref.load %arg3[%c6] : memref<98xf32, #tpu.memory_space<smem>>
      %c7 = arith.constant 7 : index
      %25 = memref.load %arg3[%c7] : memref<98xf32, #tpu.memory_space<smem>>
      %c8 = arith.constant 8 : index
      %26 = memref.load %arg3[%c8] : memref<98xf32, #tpu.memory_space<smem>>
      %c9 = arith.constant 9 : index
      %27 = memref.load %arg3[%c9] : memref<98xf32, #tpu.memory_space<smem>>
      %c10 = arith.constant 10 : index
      %28 = memref.load %arg3[%c10] : memref<98xf32, #tpu.memory_space<smem>>
      %c11 = arith.constant 11 : index
      %29 = memref.load %arg3[%c11] : memref<98xf32, #tpu.memory_space<smem>>
      %c12 = arith.constant 12 : index
      %30 = memref.load %arg3[%c12] : memref<98xf32, #tpu.memory_space<smem>>
      %c13 = arith.constant 13 : index
      %31 = memref.load %arg3[%c13] : memref<98xf32, #tpu.memory_space<smem>>
      %c14 = arith.constant 14 : index
      %32 = memref.load %arg3[%c14] : memref<98xf32, #tpu.memory_space<smem>>
      %c15 = arith.constant 15 : index
      %33 = memref.load %arg3[%c15] : memref<98xf32, #tpu.memory_space<smem>>
      %c16 = arith.constant 16 : index
      %34 = memref.load %arg3[%c16] : memref<98xf32, #tpu.memory_space<smem>>
      %c17 = arith.constant 17 : index
      %35 = memref.load %arg3[%c17] : memref<98xf32, #tpu.memory_space<smem>>
      %c18 = arith.constant 18 : index
      %36 = memref.load %arg3[%c18] : memref<98xf32, #tpu.memory_space<smem>>
      %c19 = arith.constant 19 : index
      %37 = memref.load %arg3[%c19] : memref<98xf32, #tpu.memory_space<smem>>
      %c20 = arith.constant 20 : index
      %38 = memref.load %arg3[%c20] : memref<98xf32, #tpu.memory_space<smem>>
      %c21 = arith.constant 21 : index
      %39 = memref.load %arg3[%c21] : memref<98xf32, #tpu.memory_space<smem>>
      %c22 = arith.constant 22 : index
      %40 = memref.load %arg3[%c22] : memref<98xf32, #tpu.memory_space<smem>>
      %c23 = arith.constant 23 : index
      %41 = memref.load %arg3[%c23] : memref<98xf32, #tpu.memory_space<smem>>
      %c24 = arith.constant 24 : index
      %42 = memref.load %arg3[%c24] : memref<98xf32, #tpu.memory_space<smem>>
      %c25 = arith.constant 25 : index
      %43 = memref.load %arg3[%c25] : memref<98xf32, #tpu.memory_space<smem>>
      %c26 = arith.constant 26 : index
      %44 = memref.load %arg3[%c26] : memref<98xf32, #tpu.memory_space<smem>>
      %c27 = arith.constant 27 : index
      %45 = memref.load %arg3[%c27] : memref<98xf32, #tpu.memory_space<smem>>
      %c28 = arith.constant 28 : index
      %46 = memref.load %arg3[%c28] : memref<98xf32, #tpu.memory_space<smem>>
      %c29 = arith.constant 29 : index
      %47 = memref.load %arg3[%c29] : memref<98xf32, #tpu.memory_space<smem>>
      %c30 = arith.constant 30 : index
      %48 = memref.load %arg3[%c30] : memref<98xf32, #tpu.memory_space<smem>>
      %c31 = arith.constant 31 : index
      %49 = memref.load %arg3[%c31] : memref<98xf32, #tpu.memory_space<smem>>
      %c32 = arith.constant 32 : index
      %50 = memref.load %arg3[%c32] : memref<98xf32, #tpu.memory_space<smem>>
      %c33 = arith.constant 33 : index
      %51 = memref.load %arg3[%c33] : memref<98xf32, #tpu.memory_space<smem>>
      %c34 = arith.constant 34 : index
      %52 = memref.load %arg3[%c34] : memref<98xf32, #tpu.memory_space<smem>>
      %c35 = arith.constant 35 : index
      %53 = memref.load %arg3[%c35] : memref<98xf32, #tpu.memory_space<smem>>
      %c36 = arith.constant 36 : index
      %54 = memref.load %arg3[%c36] : memref<98xf32, #tpu.memory_space<smem>>
      %c37 = arith.constant 37 : index
      %55 = memref.load %arg3[%c37] : memref<98xf32, #tpu.memory_space<smem>>
      %c38 = arith.constant 38 : index
      %56 = memref.load %arg3[%c38] : memref<98xf32, #tpu.memory_space<smem>>
      %c39 = arith.constant 39 : index
      %57 = memref.load %arg3[%c39] : memref<98xf32, #tpu.memory_space<smem>>
      %c40 = arith.constant 40 : index
      %58 = memref.load %arg3[%c40] : memref<98xf32, #tpu.memory_space<smem>>
      %c41 = arith.constant 41 : index
      %59 = memref.load %arg3[%c41] : memref<98xf32, #tpu.memory_space<smem>>
      %c42 = arith.constant 42 : index
      %60 = memref.load %arg3[%c42] : memref<98xf32, #tpu.memory_space<smem>>
      %c43 = arith.constant 43 : index
      %61 = memref.load %arg3[%c43] : memref<98xf32, #tpu.memory_space<smem>>
      %c44 = arith.constant 44 : index
      %62 = memref.load %arg3[%c44] : memref<98xf32, #tpu.memory_space<smem>>
      %c45 = arith.constant 45 : index
      %63 = memref.load %arg3[%c45] : memref<98xf32, #tpu.memory_space<smem>>
      %c46 = arith.constant 46 : index
      %64 = memref.load %arg3[%c46] : memref<98xf32, #tpu.memory_space<smem>>
      %c47 = arith.constant 47 : index
      %65 = memref.load %arg3[%c47] : memref<98xf32, #tpu.memory_space<smem>>
      %c48 = arith.constant 48 : index
      %66 = memref.load %arg3[%c48] : memref<98xf32, #tpu.memory_space<smem>>
      %c49 = arith.constant 49 : index
      %67 = memref.load %arg3[%c49] : memref<98xf32, #tpu.memory_space<smem>>
      %c50 = arith.constant 50 : index
      %68 = memref.load %arg3[%c50] : memref<98xf32, #tpu.memory_space<smem>>
      %c51 = arith.constant 51 : index
      %69 = memref.load %arg3[%c51] : memref<98xf32, #tpu.memory_space<smem>>
      %c52 = arith.constant 52 : index
      %70 = memref.load %arg3[%c52] : memref<98xf32, #tpu.memory_space<smem>>
      %c53 = arith.constant 53 : index
      %71 = memref.load %arg3[%c53] : memref<98xf32, #tpu.memory_space<smem>>
      %c54 = arith.constant 54 : index
      %72 = memref.load %arg3[%c54] : memref<98xf32, #tpu.memory_space<smem>>
      %c55 = arith.constant 55 : index
      %73 = memref.load %arg3[%c55] : memref<98xf32, #tpu.memory_space<smem>>
      %c56 = arith.constant 56 : index
      %74 = memref.load %arg3[%c56] : memref<98xf32, #tpu.memory_space<smem>>
      %c57 = arith.constant 57 : index
      %75 = memref.load %arg3[%c57] : memref<98xf32, #tpu.memory_space<smem>>
      %c58 = arith.constant 58 : index
      %76 = memref.load %arg3[%c58] : memref<98xf32, #tpu.memory_space<smem>>
      %c59 = arith.constant 59 : index
      %77 = memref.load %arg3[%c59] : memref<98xf32, #tpu.memory_space<smem>>
      %c60 = arith.constant 60 : index
      %78 = memref.load %arg3[%c60] : memref<98xf32, #tpu.memory_space<smem>>
      %c61 = arith.constant 61 : index
      %79 = memref.load %arg3[%c61] : memref<98xf32, #tpu.memory_space<smem>>
      %c62 = arith.constant 62 : index
      %80 = memref.load %arg3[%c62] : memref<98xf32, #tpu.memory_space<smem>>
      %c63 = arith.constant 63 : index
      %81 = memref.load %arg3[%c63] : memref<98xf32, #tpu.memory_space<smem>>
      %c64 = arith.constant 64 : index
      %82 = memref.load %arg3[%c64] : memref<98xf32, #tpu.memory_space<smem>>
      %c65 = arith.constant 65 : index
      %83 = memref.load %arg3[%c65] : memref<98xf32, #tpu.memory_space<smem>>
      %c66 = arith.constant 66 : index
      %84 = memref.load %arg3[%c66] : memref<98xf32, #tpu.memory_space<smem>>
      %c67 = arith.constant 67 : index
      %85 = memref.load %arg3[%c67] : memref<98xf32, #tpu.memory_space<smem>>
      %c68 = arith.constant 68 : index
      %86 = memref.load %arg3[%c68] : memref<98xf32, #tpu.memory_space<smem>>
      %c69 = arith.constant 69 : index
      %87 = memref.load %arg3[%c69] : memref<98xf32, #tpu.memory_space<smem>>
      %c70 = arith.constant 70 : index
      %88 = memref.load %arg3[%c70] : memref<98xf32, #tpu.memory_space<smem>>
      %c71 = arith.constant 71 : index
      %89 = memref.load %arg3[%c71] : memref<98xf32, #tpu.memory_space<smem>>
      %c72 = arith.constant 72 : index
      %90 = memref.load %arg3[%c72] : memref<98xf32, #tpu.memory_space<smem>>
      %c73 = arith.constant 73 : index
      %91 = memref.load %arg3[%c73] : memref<98xf32, #tpu.memory_space<smem>>
      %c74 = arith.constant 74 : index
      %92 = memref.load %arg3[%c74] : memref<98xf32, #tpu.memory_space<smem>>
      %c75 = arith.constant 75 : index
      %93 = memref.load %arg3[%c75] : memref<98xf32, #tpu.memory_space<smem>>
      %c76 = arith.constant 76 : index
      %94 = memref.load %arg3[%c76] : memref<98xf32, #tpu.memory_space<smem>>
      %c77 = arith.constant 77 : index
      %95 = memref.load %arg3[%c77] : memref<98xf32, #tpu.memory_space<smem>>
      %c78 = arith.constant 78 : index
      %96 = memref.load %arg3[%c78] : memref<98xf32, #tpu.memory_space<smem>>
      %c79 = arith.constant 79 : index
      %97 = memref.load %arg3[%c79] : memref<98xf32, #tpu.memory_space<smem>>
      %c80 = arith.constant 80 : index
      %98 = memref.load %arg3[%c80] : memref<98xf32, #tpu.memory_space<smem>>
      %c81 = arith.constant 81 : index
      %99 = memref.load %arg3[%c81] : memref<98xf32, #tpu.memory_space<smem>>
      %c82 = arith.constant 82 : index
      %100 = memref.load %arg3[%c82] : memref<98xf32, #tpu.memory_space<smem>>
      %c83 = arith.constant 83 : index
      %101 = memref.load %arg3[%c83] : memref<98xf32, #tpu.memory_space<smem>>
      %c84 = arith.constant 84 : index
      %102 = memref.load %arg3[%c84] : memref<98xf32, #tpu.memory_space<smem>>
      %c85 = arith.constant 85 : index
      %103 = memref.load %arg3[%c85] : memref<98xf32, #tpu.memory_space<smem>>
      %c86 = arith.constant 86 : index
      %104 = memref.load %arg3[%c86] : memref<98xf32, #tpu.memory_space<smem>>
      %c87 = arith.constant 87 : index
      %105 = memref.load %arg3[%c87] : memref<98xf32, #tpu.memory_space<smem>>
      %c88 = arith.constant 88 : index
      %106 = memref.load %arg3[%c88] : memref<98xf32, #tpu.memory_space<smem>>
      %c89 = arith.constant 89 : index
      %107 = memref.load %arg3[%c89] : memref<98xf32, #tpu.memory_space<smem>>
      %c90 = arith.constant 90 : index
      %108 = memref.load %arg3[%c90] : memref<98xf32, #tpu.memory_space<smem>>
      %c91 = arith.constant 91 : index
      %109 = memref.load %arg3[%c91] : memref<98xf32, #tpu.memory_space<smem>>
      %c92 = arith.constant 92 : index
      %110 = memref.load %arg3[%c92] : memref<98xf32, #tpu.memory_space<smem>>
      %c93 = arith.constant 93 : index
      %111 = memref.load %arg3[%c93] : memref<98xf32, #tpu.memory_space<smem>>
      %c94 = arith.constant 94 : index
      %112 = memref.load %arg3[%c94] : memref<98xf32, #tpu.memory_space<smem>>
      %c95 = arith.constant 95 : index
      %113 = memref.load %arg3[%c95] : memref<98xf32, #tpu.memory_space<smem>>
      %c96 = arith.constant 96 : index
      %114 = memref.load %arg3[%c96] : memref<98xf32, #tpu.memory_space<smem>>
      %c97 = arith.constant 97 : index
      %115 = memref.load %arg3[%c97] : memref<98xf32, #tpu.memory_space<smem>>
      %116 = tpu.iota {dimensions = array<i32: 1>} : vector<2x256xi32>
      %c16_i32 = arith.constant 16 : i32
      %c0_i32_18 = arith.constant 0 : i32
      %117 = arith.cmpi eq, %c16_i32, %c0_i32_18 : i32
      %c1_i32 = arith.constant 1 : i32
      %118 = arith.select %117, %c1_i32, %c16_i32 : i32
      %119 = vector.broadcast %118 : i32 to vector<2x256xi32>
      %120 = arith.remsi %116, %119 : vector<2x256xi32>
      %c0_i32_19 = arith.constant 0 : i32
      %121 = vector.broadcast %c0_i32_19 : i32 to vector<2x256xi32>
      %122 = arith.cmpi ne, %120, %121 : vector<2x256xi32>
      %c0_i32_20 = arith.constant 0 : i32
      %123 = vector.broadcast %c0_i32_20 : i32 to vector<2x256xi32>
      %124 = arith.cmpi slt, %120, %123 : vector<2x256xi32>
      %c0_i32_21 = arith.constant 0 : i32
      %125 = arith.cmpi slt, %118, %c0_i32_21 : i32
      %126 = vector.broadcast %125 : i1 to vector<2x256xi1>
      %127 = vector.broadcast %126 : vector<2x256xi1> to vector<2x256xi1>
      %128 = arith.xori %124, %127 : vector<2x256xi1>
      %129 = arith.andi %128, %122 : vector<2x256xi1>
      %130 = vector.broadcast %118 : i32 to vector<2x256xi32>
      %131 = arith.addi %120, %130 : vector<2x256xi32>
      %132 = arith.select %129, %131, %120 : vector<2x256xi1>, vector<2x256xi32>
      %c3_i32 = arith.constant 3 : i32
      %133 = vector.broadcast %c3_i32 : i32 to vector<2x256xi32>
      %134 = arith.cmpi sge, %132, %133 : vector<2x256xi32>
      %c19_i32 = arith.constant 19 : i32
      %135 = vector.broadcast %c19_i32 : i32 to vector<2x256xi32>
      %136 = arith.cmpi slt, %132, %135 : vector<2x256xi32>
      %137 = arith.andi %134, %136 : vector<2x256xi1>
      %c0_22 = arith.constant 0 : index
      %c77_23 = arith.constant 77 : index
      %138 = vector.load %arg5[%c0_22, %c77_23] : memref<2x512xf32, #tpu.memory_space<vmem>>, vector<2x256xf32>
      %c0_24 = arith.constant 0 : index
      %c77_25 = arith.constant 77 : index
      %139 = vector.load %arg6[%c0_24, %c77_25] : memref<2x512xf32, #tpu.memory_space<vmem>>, vector<2x256xf32>
      %140 = vector.broadcast %18 : f32 to vector<2x256xf32>
      %141 = arith.mulf %140, %138 : vector<2x256xf32>
      %142 = vector.broadcast %67 : f32 to vector<2x256xf32>
      %143 = arith.mulf %142, %139 : vector<2x256xf32>
      %144 = arith.addf %141, %143 : vector<2x256xf32>
      %c0_26 = arith.constant 0 : index
      %c93_27 = arith.constant 93 : index
      %145 = vector.load %arg5[%c0_26, %c93_27] : memref<2x512xf32, #tpu.memory_space<vmem>>, vector<2x256xf32>
      %c0_28 = arith.constant 0 : index
      %c93_29 = arith.constant 93 : index
      %146 = vector.load %arg6[%c0_28, %c93_29] : memref<2x512xf32, #tpu.memory_space<vmem>>, vector<2x256xf32>
      %147 = vector.broadcast %25 : f32 to vector<2x256xf32>
      %148 = arith.mulf %147, %145 : vector<2x256xf32>
      %149 = vector.broadcast %74 : f32 to vector<2x256xf32>
      %150 = arith.mulf %149, %146 : vector<2x256xf32>
      %151 = arith.addf %148, %150 : vector<2x256xf32>
      %c0_30 = arith.constant 0 : index
      %c109 = arith.constant 109 : index
      %152 = vector.load %arg5[%c0_30, %c109] : memref<2x512xf32, #tpu.memory_space<vmem>>, vector<2x256xf32>
      %c0_31 = arith.constant 0 : index
      %c109_32 = arith.constant 109 : index
      %153 = vector.load %arg6[%c0_31, %c109_32] : memref<2x512xf32, #tpu.memory_space<vmem>>, vector<2x256xf32>
      %154 = vector.broadcast %32 : f32 to vector<2x256xf32>
      %155 = arith.mulf %154, %152 : vector<2x256xf32>
      %156 = vector.broadcast %81 : f32 to vector<2x256xf32>
      %157 = arith.mulf %156, %153 : vector<2x256xf32>
      %158 = arith.addf %155, %157 : vector<2x256xf32>
      %c0_33 = arith.constant 0 : index
      %c125 = arith.constant 125 : index
      %159 = vector.load %arg5[%c0_33, %c125] : memref<2x512xf32, #tpu.memory_space<vmem>>, vector<2x256xf32>
      %c0_34 = arith.constant 0 : index
      %c125_35 = arith.constant 125 : index
      %160 = vector.load %arg6[%c0_34, %c125_35] : memref<2x512xf32, #tpu.memory_space<vmem>>, vector<2x256xf32>
      %161 = vector.broadcast %39 : f32 to vector<2x256xf32>
      %162 = arith.mulf %161, %159 : vector<2x256xf32>
      %163 = vector.broadcast %88 : f32 to vector<2x256xf32>
      %164 = arith.mulf %163, %160 : vector<2x256xf32>
      %165 = arith.addf %162, %164 : vector<2x256xf32>
      %c0_36 = arith.constant 0 : index
      %c141 = arith.constant 141 : index
      %166 = vector.load %arg5[%c0_36, %c141] : memref<2x512xf32, #tpu.memory_space<vmem>>, vector<2x256xf32>
      %c0_37 = arith.constant 0 : index
      %c141_38 = arith.constant 141 : index
      %167 = vector.load %arg6[%c0_37, %c141_38] : memref<2x512xf32, #tpu.memory_space<vmem>>, vector<2x256xf32>
      %168 = vector.broadcast %46 : f32 to vector<2x256xf32>
      %169 = arith.mulf %168, %166 : vector<2x256xf32>
      %170 = vector.broadcast %95 : f32 to vector<2x256xf32>
      %171 = arith.mulf %170, %167 : vector<2x256xf32>
      %172 = arith.addf %169, %171 : vector<2x256xf32>
      %c0_39 = arith.constant 0 : index
      %c157 = arith.constant 157 : index
      %173 = vector.load %arg5[%c0_39, %c157] : memref<2x512xf32, #tpu.memory_space<vmem>>, vector<2x256xf32>
      %c0_40 = arith.constant 0 : index
      %c157_41 = arith.constant 157 : index
      %174 = vector.load %arg6[%c0_40, %c157_41] : memref<2x512xf32, #tpu.memory_space<vmem>>, vector<2x256xf32>
      %175 = vector.broadcast %53 : f32 to vector<2x256xf32>
      %176 = arith.mulf %175, %173 : vector<2x256xf32>
      %177 = vector.broadcast %102 : f32 to vector<2x256xf32>
      %178 = arith.mulf %177, %174 : vector<2x256xf32>
      %179 = arith.addf %176, %178 : vector<2x256xf32>
      %c0_42 = arith.constant 0 : index
      %c173 = arith.constant 173 : index
      %180 = vector.load %arg5[%c0_42, %c173] : memref<2x512xf32, #tpu.memory_space<vmem>>, vector<2x256xf32>
      %c0_43 = arith.constant 0 : index
      %c173_44 = arith.constant 173 : index
      %181 = vector.load %arg6[%c0_43, %c173_44] : memref<2x512xf32, #tpu.memory_space<vmem>>, vector<2x256xf32>
      %182 = vector.broadcast %60 : f32 to vector<2x256xf32>
      %183 = arith.mulf %182, %180 : vector<2x256xf32>
      %184 = vector.broadcast %109 : f32 to vector<2x256xf32>
      %185 = arith.mulf %184, %181 : vector<2x256xf32>
      %186 = arith.addf %183, %185 : vector<2x256xf32>
      %187 = arith.addf %144, %151 : vector<2x256xf32>
      %188 = arith.addf %158, %165 : vector<2x256xf32>
      %189 = arith.addf %172, %179 : vector<2x256xf32>
      %190 = arith.addf %187, %188 : vector<2x256xf32>
      %191 = arith.addf %189, %186 : vector<2x256xf32>
      %192 = arith.addf %190, %191 : vector<2x256xf32>
      %cst_45 = arith.constant 0.000000e+00 : f32
      %193 = vector.broadcast %cst_45 : f32 to vector<2x256xf32>
      %194 = arith.select %137, %192, %193 : vector<2x256xi1>, vector<2x256xf32>
      %c2_i32 = arith.constant 2 : i32
      %195 = vector.broadcast %c2_i32 : i32 to vector<2x256xi32>
      %196 = arith.cmpi sge, %132, %195 : vector<2x256xi32>
      %c18_i32 = arith.constant 18 : i32
      %197 = vector.broadcast %c18_i32 : i32 to vector<2x256xi32>
      %198 = arith.cmpi slt, %132, %197 : vector<2x256xi32>
      %199 = arith.andi %196, %198 : vector<2x256xi1>
      %c0_46 = arith.constant 0 : index
      %c78_47 = arith.constant 78 : index
      %200 = vector.load %arg5[%c0_46, %c78_47] : memref<2x512xf32, #tpu.memory_space<vmem>>, vector<2x256xf32>
      %c0_48 = arith.constant 0 : index
      %c78_49 = arith.constant 78 : index
      %201 = vector.load %arg6[%c0_48, %c78_49] : memref<2x512xf32, #tpu.memory_space<vmem>>, vector<2x256xf32>
      %202 = vector.broadcast %19 : f32 to vector<2x256xf32>
      %203 = arith.mulf %202, %200 : vector<2x256xf32>
      %204 = vector.broadcast %68 : f32 to vector<2x256xf32>
      %205 = arith.mulf %204, %201 : vector<2x256xf32>
      %206 = arith.addf %203, %205 : vector<2x256xf32>
      %c0_50 = arith.constant 0 : index
      %c94_51 = arith.constant 94 : index
      %207 = vector.load %arg5[%c0_50, %c94_51] : memref<2x512xf32, #tpu.memory_space<vmem>>, vector<2x256xf32>
      %c0_52 = arith.constant 0 : index
      %c94_53 = arith.constant 94 : index
      %208 = vector.load %arg6[%c0_52, %c94_53] : memref<2x512xf32, #tpu.memory_space<vmem>>, vector<2x256xf32>
      %209 = vector.broadcast %26 : f32 to vector<2x256xf32>
      %210 = arith.mulf %209, %207 : vector<2x256xf32>
      %211 = vector.broadcast %75 : f32 to vector<2x256xf32>
      %212 = arith.mulf %211, %208 : vector<2x256xf32>
      %213 = arith.addf %210, %212 : vector<2x256xf32>
      %c0_54 = arith.constant 0 : index
      %c110 = arith.constant 110 : index
      %214 = vector.load %arg5[%c0_54, %c110] : memref<2x512xf32, #tpu.memory_space<vmem>>, vector<2x256xf32>
      %c0_55 = arith.constant 0 : index
      %c110_56 = arith.constant 110 : index
      %215 = vector.load %arg6[%c0_55, %c110_56] : memref<2x512xf32, #tpu.memory_space<vmem>>, vector<2x256xf32>
      %216 = vector.broadcast %33 : f32 to vector<2x256xf32>
      %217 = arith.mulf %216, %214 : vector<2x256xf32>
      %218 = vector.broadcast %82 : f32 to vector<2x256xf32>
      %219 = arith.mulf %218, %215 : vector<2x256xf32>
      %220 = arith.addf %217, %219 : vector<2x256xf32>
      %c0_57 = arith.constant 0 : index
      %c126 = arith.constant 126 : index
      %221 = vector.load %arg5[%c0_57, %c126] : memref<2x512xf32, #tpu.memory_space<vmem>>, vector<2x256xf32>
      %c0_58 = arith.constant 0 : index
      %c126_59 = arith.constant 126 : index
      %222 = vector.load %arg6[%c0_58, %c126_59] : memref<2x512xf32, #tpu.memory_space<vmem>>, vector<2x256xf32>
      %223 = vector.broadcast %40 : f32 to vector<2x256xf32>
      %224 = arith.mulf %223, %221 : vector<2x256xf32>
      %225 = vector.broadcast %89 : f32 to vector<2x256xf32>
      %226 = arith.mulf %225, %222 : vector<2x256xf32>
      %227 = arith.addf %224, %226 : vector<2x256xf32>
      %c0_60 = arith.constant 0 : index
      %c142 = arith.constant 142 : index
      %228 = vector.load %arg5[%c0_60, %c142] : memref<2x512xf32, #tpu.memory_space<vmem>>, vector<2x256xf32>
      %c0_61 = arith.constant 0 : index
      %c142_62 = arith.constant 142 : index
      %229 = vector.load %arg6[%c0_61, %c142_62] : memref<2x512xf32, #tpu.memory_space<vmem>>, vector<2x256xf32>
      %230 = vector.broadcast %47 : f32 to vector<2x256xf32>
      %231 = arith.mulf %230, %228 : vector<2x256xf32>
      %232 = vector.broadcast %96 : f32 to vector<2x256xf32>
      %233 = arith.mulf %232, %229 : vector<2x256xf32>
      %234 = arith.addf %231, %233 : vector<2x256xf32>
      %c0_63 = arith.constant 0 : index
      %c158 = arith.constant 158 : index
      %235 = vector.load %arg5[%c0_63, %c158] : memref<2x512xf32, #tpu.memory_space<vmem>>, vector<2x256xf32>
      %c0_64 = arith.constant 0 : index
      %c158_65 = arith.constant 158 : index
      %236 = vector.load %arg6[%c0_64, %c158_65] : memref<2x512xf32, #tpu.memory_space<vmem>>, vector<2x256xf32>
      %237 = vector.broadcast %54 : f32 to vector<2x256xf32>
      %238 = arith.mulf %237, %235 : vector<2x256xf32>
      %239 = vector.broadcast %103 : f32 to vector<2x256xf32>
      %240 = arith.mulf %239, %236 : vector<2x256xf32>
      %241 = arith.addf %238, %240 : vector<2x256xf32>
      %c0_66 = arith.constant 0 : index
      %c174 = arith.constant 174 : index
      %242 = vector.load %arg5[%c0_66, %c174] : memref<2x512xf32, #tpu.memory_space<vmem>>, vector<2x256xf32>
      %c0_67 = arith.constant 0 : index
      %c174_68 = arith.constant 174 : index
      %243 = vector.load %arg6[%c0_67, %c174_68] : memref<2x512xf32, #tpu.memory_space<vmem>>, vector<2x256xf32>
      %244 = vector.broadcast %61 : f32 to vector<2x256xf32>
      %245 = arith.mulf %244, %242 : vector<2x256xf32>
      %246 = vector.broadcast %110 : f32 to vector<2x256xf32>
      %247 = arith.mulf %246, %243 : vector<2x256xf32>
      %248 = arith.addf %245, %247 : vector<2x256xf32>
      %249 = arith.addf %206, %213 : vector<2x256xf32>
      %250 = arith.addf %220, %227 : vector<2x256xf32>
      %251 = arith.addf %234, %241 : vector<2x256xf32>
      %252 = arith.addf %249, %250 : vector<2x256xf32>
      %253 = arith.addf %251, %248 : vector<2x256xf32>
      %254 = arith.addf %252, %253 : vector<2x256xf32>
      %cst_69 = arith.constant 0.000000e+00 : f32
      %255 = vector.broadcast %cst_69 : f32 to vector<2x256xf32>
      %256 = arith.select %199, %254, %255 : vector<2x256xi1>, vector<2x256xf32>
      %c1_i32_70 = arith.constant 1 : i32
      %257 = vector.broadcast %c1_i32_70 : i32 to vector<2x256xi32>
      %258 = arith.cmpi sge, %132, %257 : vector<2x256xi32>
      %c17_i32 = arith.constant 17 : i32
      %259 = vector.broadcast %c17_i32 : i32 to vector<2x256xi32>
      %260 = arith.cmpi slt, %132, %259 : vector<2x256xi32>
      %261 = arith.andi %258, %260 : vector<2x256xi1>
      %c0_71 = arith.constant 0 : index
      %c79_72 = arith.constant 79 : index
      %262 = vector.load %arg5[%c0_71, %c79_72] : memref<2x512xf32, #tpu.memory_space<vmem>>, vector<2x256xf32>
      %c0_73 = arith.constant 0 : index
      %c79_74 = arith.constant 79 : index
      %263 = vector.load %arg6[%c0_73, %c79_74] : memref<2x512xf32, #tpu.memory_space<vmem>>, vector<2x256xf32>
      %264 = vector.broadcast %20 : f32 to vector<2x256xf32>
      %265 = arith.mulf %264, %262 : vector<2x256xf32>
      %266 = vector.broadcast %69 : f32 to vector<2x256xf32>
      %267 = arith.mulf %266, %263 : vector<2x256xf32>
      %268 = arith.addf %265, %267 : vector<2x256xf32>
      %c0_75 = arith.constant 0 : index
      %c95_76 = arith.constant 95 : index
      %269 = vector.load %arg5[%c0_75, %c95_76] : memref<2x512xf32, #tpu.memory_space<vmem>>, vector<2x256xf32>
      %c0_77 = arith.constant 0 : index
      %c95_78 = arith.constant 95 : index
      %270 = vector.load %arg6[%c0_77, %c95_78] : memref<2x512xf32, #tpu.memory_space<vmem>>, vector<2x256xf32>
      %271 = vector.broadcast %27 : f32 to vector<2x256xf32>
      %272 = arith.mulf %271, %269 : vector<2x256xf32>
      %273 = vector.broadcast %76 : f32 to vector<2x256xf32>
      %274 = arith.mulf %273, %270 : vector<2x256xf32>
      %275 = arith.addf %272, %274 : vector<2x256xf32>
      %c0_79 = arith.constant 0 : index
      %c111 = arith.constant 111 : index
      %276 = vector.load %arg5[%c0_79, %c111] : memref<2x512xf32, #tpu.memory_space<vmem>>, vector<2x256xf32>
      %c0_80 = arith.constant 0 : index
      %c111_81 = arith.constant 111 : index
      %277 = vector.load %arg6[%c0_80, %c111_81] : memref<2x512xf32, #tpu.memory_space<vmem>>, vector<2x256xf32>
      %278 = vector.broadcast %34 : f32 to vector<2x256xf32>
      %279 = arith.mulf %278, %276 : vector<2x256xf32>
      %280 = vector.broadcast %83 : f32 to vector<2x256xf32>
      %281 = arith.mulf %280, %277 : vector<2x256xf32>
      %282 = arith.addf %279, %281 : vector<2x256xf32>
      %c0_82 = arith.constant 0 : index
      %c127 = arith.constant 127 : index
      %283 = vector.load %arg5[%c0_82, %c127] : memref<2x512xf32, #tpu.memory_space<vmem>>, vector<2x256xf32>
      %c0_83 = arith.constant 0 : index
      %c127_84 = arith.constant 127 : index
      %284 = vector.load %arg6[%c0_83, %c127_84] : memref<2x512xf32, #tpu.memory_space<vmem>>, vector<2x256xf32>
      %285 = vector.broadcast %41 : f32 to vector<2x256xf32>
      %286 = arith.mulf %285, %283 : vector<2x256xf32>
      %287 = vector.broadcast %90 : f32 to vector<2x256xf32>
      %288 = arith.mulf %287, %284 : vector<2x256xf32>
      %289 = arith.addf %286, %288 : vector<2x256xf32>
      %c0_85 = arith.constant 0 : index
      %c143 = arith.constant 143 : index
      %290 = vector.load %arg5[%c0_85, %c143] : memref<2x512xf32, #tpu.memory_space<vmem>>, vector<2x256xf32>
      %c0_86 = arith.constant 0 : index
      %c143_87 = arith.constant 143 : index
      %291 = vector.load %arg6[%c0_86, %c143_87] : memref<2x512xf32, #tpu.memory_space<vmem>>, vector<2x256xf32>
      %292 = vector.broadcast %48 : f32 to vector<2x256xf32>
      %293 = arith.mulf %292, %290 : vector<2x256xf32>
      %294 = vector.broadcast %97 : f32 to vector<2x256xf32>
      %295 = arith.mulf %294, %291 : vector<2x256xf32>
      %296 = arith.addf %293, %295 : vector<2x256xf32>
      %c0_88 = arith.constant 0 : index
      %c159 = arith.constant 159 : index
      %297 = vector.load %arg5[%c0_88, %c159] : memref<2x512xf32, #tpu.memory_space<vmem>>, vector<2x256xf32>
      %c0_89 = arith.constant 0 : index
      %c159_90 = arith.constant 159 : index
      %298 = vector.load %arg6[%c0_89, %c159_90] : memref<2x512xf32, #tpu.memory_space<vmem>>, vector<2x256xf32>
      %299 = vector.broadcast %55 : f32 to vector<2x256xf32>
      %300 = arith.mulf %299, %297 : vector<2x256xf32>
      %301 = vector.broadcast %104 : f32 to vector<2x256xf32>
      %302 = arith.mulf %301, %298 : vector<2x256xf32>
      %303 = arith.addf %300, %302 : vector<2x256xf32>
      %c0_91 = arith.constant 0 : index
      %c175 = arith.constant 175 : index
      %304 = vector.load %arg5[%c0_91, %c175] : memref<2x512xf32, #tpu.memory_space<vmem>>, vector<2x256xf32>
      %c0_92 = arith.constant 0 : index
      %c175_93 = arith.constant 175 : index
      %305 = vector.load %arg6[%c0_92, %c175_93] : memref<2x512xf32, #tpu.memory_space<vmem>>, vector<2x256xf32>
      %306 = vector.broadcast %62 : f32 to vector<2x256xf32>
      %307 = arith.mulf %306, %304 : vector<2x256xf32>
      %308 = vector.broadcast %111 : f32 to vector<2x256xf32>
      %309 = arith.mulf %308, %305 : vector<2x256xf32>
      %310 = arith.addf %307, %309 : vector<2x256xf32>
      %311 = arith.addf %268, %275 : vector<2x256xf32>
      %312 = arith.addf %282, %289 : vector<2x256xf32>
      %313 = arith.addf %296, %303 : vector<2x256xf32>
      %314 = arith.addf %311, %312 : vector<2x256xf32>
      %315 = arith.addf %313, %310 : vector<2x256xf32>
      %316 = arith.addf %314, %315 : vector<2x256xf32>
      %cst_94 = arith.constant 0.000000e+00 : f32
      %317 = vector.broadcast %cst_94 : f32 to vector<2x256xf32>
      %318 = arith.select %261, %316, %317 : vector<2x256xi1>, vector<2x256xf32>
      %c0_i32_95 = arith.constant 0 : i32
      %319 = vector.broadcast %c0_i32_95 : i32 to vector<2x256xi32>
      %320 = arith.cmpi sge, %132, %319 : vector<2x256xi32>
      %c16_i32_96 = arith.constant 16 : i32
      %321 = vector.broadcast %c16_i32_96 : i32 to vector<2x256xi32>
      %322 = arith.cmpi slt, %132, %321 : vector<2x256xi32>
      %323 = arith.andi %320, %322 : vector<2x256xi1>
      %c0_97 = arith.constant 0 : index
      %c80_98 = arith.constant 80 : index
      %324 = vector.load %arg5[%c0_97, %c80_98] : memref<2x512xf32, #tpu.memory_space<vmem>>, vector<2x256xf32>
      %c0_99 = arith.constant 0 : index
      %c80_100 = arith.constant 80 : index
      %325 = vector.load %arg6[%c0_99, %c80_100] : memref<2x512xf32, #tpu.memory_space<vmem>>, vector<2x256xf32>
      %326 = vector.broadcast %21 : f32 to vector<2x256xf32>
      %327 = arith.mulf %326, %324 : vector<2x256xf32>
      %328 = vector.broadcast %70 : f32 to vector<2x256xf32>
      %329 = arith.mulf %328, %325 : vector<2x256xf32>
      %330 = arith.addf %327, %329 : vector<2x256xf32>
      %c0_101 = arith.constant 0 : index
      %c96_102 = arith.constant 96 : index
      %331 = vector.load %arg5[%c0_101, %c96_102] : memref<2x512xf32, #tpu.memory_space<vmem>>, vector<2x256xf32>
      %c0_103 = arith.constant 0 : index
      %c96_104 = arith.constant 96 : index
      %332 = vector.load %arg6[%c0_103, %c96_104] : memref<2x512xf32, #tpu.memory_space<vmem>>, vector<2x256xf32>
      %333 = vector.broadcast %28 : f32 to vector<2x256xf32>
      %334 = arith.mulf %333, %331 : vector<2x256xf32>
      %335 = vector.broadcast %77 : f32 to vector<2x256xf32>
      %336 = arith.mulf %335, %332 : vector<2x256xf32>
      %337 = arith.addf %334, %336 : vector<2x256xf32>
      %c0_105 = arith.constant 0 : index
      %c112 = arith.constant 112 : index
      %338 = vector.load %arg5[%c0_105, %c112] : memref<2x512xf32, #tpu.memory_space<vmem>>, vector<2x256xf32>
      %c0_106 = arith.constant 0 : index
      %c112_107 = arith.constant 112 : index
      %339 = vector.load %arg6[%c0_106, %c112_107] : memref<2x512xf32, #tpu.memory_space<vmem>>, vector<2x256xf32>
      %340 = vector.broadcast %35 : f32 to vector<2x256xf32>
      %341 = arith.mulf %340, %338 : vector<2x256xf32>
      %342 = vector.broadcast %84 : f32 to vector<2x256xf32>
      %343 = arith.mulf %342, %339 : vector<2x256xf32>
      %344 = arith.addf %341, %343 : vector<2x256xf32>
      %c0_108 = arith.constant 0 : index
      %c128 = arith.constant 128 : index
      %345 = vector.load %arg5[%c0_108, %c128] : memref<2x512xf32, #tpu.memory_space<vmem>>, vector<2x256xf32>
      %c0_109 = arith.constant 0 : index
      %c128_110 = arith.constant 128 : index
      %346 = vector.load %arg6[%c0_109, %c128_110] : memref<2x512xf32, #tpu.memory_space<vmem>>, vector<2x256xf32>
      %347 = vector.broadcast %42 : f32 to vector<2x256xf32>
      %348 = arith.mulf %347, %345 : vector<2x256xf32>
      %349 = vector.broadcast %91 : f32 to vector<2x256xf32>
      %350 = arith.mulf %349, %346 : vector<2x256xf32>
      %351 = arith.addf %348, %350 : vector<2x256xf32>
      %c0_111 = arith.constant 0 : index
      %c144 = arith.constant 144 : index
      %352 = vector.load %arg5[%c0_111, %c144] : memref<2x512xf32, #tpu.memory_space<vmem>>, vector<2x256xf32>
      %c0_112 = arith.constant 0 : index
      %c144_113 = arith.constant 144 : index
      %353 = vector.load %arg6[%c0_112, %c144_113] : memref<2x512xf32, #tpu.memory_space<vmem>>, vector<2x256xf32>
      %354 = vector.broadcast %49 : f32 to vector<2x256xf32>
      %355 = arith.mulf %354, %352 : vector<2x256xf32>
      %356 = vector.broadcast %98 : f32 to vector<2x256xf32>
      %357 = arith.mulf %356, %353 : vector<2x256xf32>
      %358 = arith.addf %355, %357 : vector<2x256xf32>
      %c0_114 = arith.constant 0 : index
      %c160 = arith.constant 160 : index
      %359 = vector.load %arg5[%c0_114, %c160] : memref<2x512xf32, #tpu.memory_space<vmem>>, vector<2x256xf32>
      %c0_115 = arith.constant 0 : index
      %c160_116 = arith.constant 160 : index
      %360 = vector.load %arg6[%c0_115, %c160_116] : memref<2x512xf32, #tpu.memory_space<vmem>>, vector<2x256xf32>
      %361 = vector.broadcast %56 : f32 to vector<2x256xf32>
      %362 = arith.mulf %361, %359 : vector<2x256xf32>
      %363 = vector.broadcast %105 : f32 to vector<2x256xf32>
      %364 = arith.mulf %363, %360 : vector<2x256xf32>
      %365 = arith.addf %362, %364 : vector<2x256xf32>
      %c0_117 = arith.constant 0 : index
      %c176 = arith.constant 176 : index
      %366 = vector.load %arg5[%c0_117, %c176] : memref<2x512xf32, #tpu.memory_space<vmem>>, vector<2x256xf32>
      %c0_118 = arith.constant 0 : index
      %c176_119 = arith.constant 176 : index
      %367 = vector.load %arg6[%c0_118, %c176_119] : memref<2x512xf32, #tpu.memory_space<vmem>>, vector<2x256xf32>
      %368 = vector.broadcast %63 : f32 to vector<2x256xf32>
      %369 = arith.mulf %368, %366 : vector<2x256xf32>
      %370 = vector.broadcast %112 : f32 to vector<2x256xf32>
      %371 = arith.mulf %370, %367 : vector<2x256xf32>
      %372 = arith.addf %369, %371 : vector<2x256xf32>
      %373 = arith.addf %330, %337 : vector<2x256xf32>
      %374 = arith.addf %344, %351 : vector<2x256xf32>
      %375 = arith.addf %358, %365 : vector<2x256xf32>
      %376 = arith.addf %373, %374 : vector<2x256xf32>
      %377 = arith.addf %375, %372 : vector<2x256xf32>
      %378 = arith.addf %376, %377 : vector<2x256xf32>
      %cst_120 = arith.constant 0.000000e+00 : f32
      %379 = vector.broadcast %cst_120 : f32 to vector<2x256xf32>
      %380 = arith.select %323, %378, %379 : vector<2x256xi1>, vector<2x256xf32>
      %c-1_i32 = arith.constant -1 : i32
      %381 = vector.broadcast %c-1_i32 : i32 to vector<2x256xi32>
      %382 = arith.cmpi sge, %132, %381 : vector<2x256xi32>
      %c15_i32 = arith.constant 15 : i32
      %383 = vector.broadcast %c15_i32 : i32 to vector<2x256xi32>
      %384 = arith.cmpi slt, %132, %383 : vector<2x256xi32>
      %385 = arith.andi %382, %384 : vector<2x256xi1>
      %c0_121 = arith.constant 0 : index
      %c81_122 = arith.constant 81 : index
      %386 = vector.load %arg5[%c0_121, %c81_122] : memref<2x512xf32, #tpu.memory_space<vmem>>, vector<2x256xf32>
      %c0_123 = arith.constant 0 : index
      %c81_124 = arith.constant 81 : index
      %387 = vector.load %arg6[%c0_123, %c81_124] : memref<2x512xf32, #tpu.memory_space<vmem>>, vector<2x256xf32>
      %388 = vector.broadcast %22 : f32 to vector<2x256xf32>
      %389 = arith.mulf %388, %386 : vector<2x256xf32>
      %390 = vector.broadcast %71 : f32 to vector<2x256xf32>
      %391 = arith.mulf %390, %387 : vector<2x256xf32>
      %392 = arith.addf %389, %391 : vector<2x256xf32>
      %c0_125 = arith.constant 0 : index
      %c97_126 = arith.constant 97 : index
      %393 = vector.load %arg5[%c0_125, %c97_126] : memref<2x512xf32, #tpu.memory_space<vmem>>, vector<2x256xf32>
      %c0_127 = arith.constant 0 : index
      %c97_128 = arith.constant 97 : index
      %394 = vector.load %arg6[%c0_127, %c97_128] : memref<2x512xf32, #tpu.memory_space<vmem>>, vector<2x256xf32>
      %395 = vector.broadcast %29 : f32 to vector<2x256xf32>
      %396 = arith.mulf %395, %393 : vector<2x256xf32>
      %397 = vector.broadcast %78 : f32 to vector<2x256xf32>
      %398 = arith.mulf %397, %394 : vector<2x256xf32>
      %399 = arith.addf %396, %398 : vector<2x256xf32>
      %c0_129 = arith.constant 0 : index
      %c113 = arith.constant 113 : index
      %400 = vector.load %arg5[%c0_129, %c113] : memref<2x512xf32, #tpu.memory_space<vmem>>, vector<2x256xf32>
      %c0_130 = arith.constant 0 : index
      %c113_131 = arith.constant 113 : index
      %401 = vector.load %arg6[%c0_130, %c113_131] : memref<2x512xf32, #tpu.memory_space<vmem>>, vector<2x256xf32>
      %402 = vector.broadcast %36 : f32 to vector<2x256xf32>
      %403 = arith.mulf %402, %400 : vector<2x256xf32>
      %404 = vector.broadcast %85 : f32 to vector<2x256xf32>
      %405 = arith.mulf %404, %401 : vector<2x256xf32>
      %406 = arith.addf %403, %405 : vector<2x256xf32>
      %c0_132 = arith.constant 0 : index
      %c129 = arith.constant 129 : index
      %407 = vector.load %arg5[%c0_132, %c129] : memref<2x512xf32, #tpu.memory_space<vmem>>, vector<2x256xf32>
      %c0_133 = arith.constant 0 : index
      %c129_134 = arith.constant 129 : index
      %408 = vector.load %arg6[%c0_133, %c129_134] : memref<2x512xf32, #tpu.memory_space<vmem>>, vector<2x256xf32>
      %409 = vector.broadcast %43 : f32 to vector<2x256xf32>
      %410 = arith.mulf %409, %407 : vector<2x256xf32>
      %411 = vector.broadcast %92 : f32 to vector<2x256xf32>
      %412 = arith.mulf %411, %408 : vector<2x256xf32>
      %413 = arith.addf %410, %412 : vector<2x256xf32>
      %c0_135 = arith.constant 0 : index
      %c145 = arith.constant 145 : index
      %414 = vector.load %arg5[%c0_135, %c145] : memref<2x512xf32, #tpu.memory_space<vmem>>, vector<2x256xf32>
      %c0_136 = arith.constant 0 : index
      %c145_137 = arith.constant 145 : index
      %415 = vector.load %arg6[%c0_136, %c145_137] : memref<2x512xf32, #tpu.memory_space<vmem>>, vector<2x256xf32>
      %416 = vector.broadcast %50 : f32 to vector<2x256xf32>
      %417 = arith.mulf %416, %414 : vector<2x256xf32>
      %418 = vector.broadcast %99 : f32 to vector<2x256xf32>
      %419 = arith.mulf %418, %415 : vector<2x256xf32>
      %420 = arith.addf %417, %419 : vector<2x256xf32>
      %c0_138 = arith.constant 0 : index
      %c161 = arith.constant 161 : index
      %421 = vector.load %arg5[%c0_138, %c161] : memref<2x512xf32, #tpu.memory_space<vmem>>, vector<2x256xf32>
      %c0_139 = arith.constant 0 : index
      %c161_140 = arith.constant 161 : index
      %422 = vector.load %arg6[%c0_139, %c161_140] : memref<2x512xf32, #tpu.memory_space<vmem>>, vector<2x256xf32>
      %423 = vector.broadcast %57 : f32 to vector<2x256xf32>
      %424 = arith.mulf %423, %421 : vector<2x256xf32>
      %425 = vector.broadcast %106 : f32 to vector<2x256xf32>
      %426 = arith.mulf %425, %422 : vector<2x256xf32>
      %427 = arith.addf %424, %426 : vector<2x256xf32>
      %c0_141 = arith.constant 0 : index
      %c177 = arith.constant 177 : index
      %428 = vector.load %arg5[%c0_141, %c177] : memref<2x512xf32, #tpu.memory_space<vmem>>, vector<2x256xf32>
      %c0_142 = arith.constant 0 : index
      %c177_143 = arith.constant 177 : index
      %429 = vector.load %arg6[%c0_142, %c177_143] : memref<2x512xf32, #tpu.memory_space<vmem>>, vector<2x256xf32>
      %430 = vector.broadcast %64 : f32 to vector<2x256xf32>
      %431 = arith.mulf %430, %428 : vector<2x256xf32>
      %432 = vector.broadcast %113 : f32 to vector<2x256xf32>
      %433 = arith.mulf %432, %429 : vector<2x256xf32>
      %434 = arith.addf %431, %433 : vector<2x256xf32>
      %435 = arith.addf %392, %399 : vector<2x256xf32>
      %436 = arith.addf %406, %413 : vector<2x256xf32>
      %437 = arith.addf %420, %427 : vector<2x256xf32>
      %438 = arith.addf %435, %436 : vector<2x256xf32>
      %439 = arith.addf %437, %434 : vector<2x256xf32>
      %440 = arith.addf %438, %439 : vector<2x256xf32>
      %cst_144 = arith.constant 0.000000e+00 : f32
      %441 = vector.broadcast %cst_144 : f32 to vector<2x256xf32>
      %442 = arith.select %385, %440, %441 : vector<2x256xi1>, vector<2x256xf32>
      %c-2_i32 = arith.constant -2 : i32
      %443 = vector.broadcast %c-2_i32 : i32 to vector<2x256xi32>
      %444 = arith.cmpi sge, %132, %443 : vector<2x256xi32>
      %c14_i32 = arith.constant 14 : i32
      %445 = vector.broadcast %c14_i32 : i32 to vector<2x256xi32>
      %446 = arith.cmpi slt, %132, %445 : vector<2x256xi32>
      %447 = arith.andi %444, %446 : vector<2x256xi1>
      %c0_145 = arith.constant 0 : index
      %c82_146 = arith.constant 82 : index
      %448 = vector.load %arg5[%c0_145, %c82_146] : memref<2x512xf32, #tpu.memory_space<vmem>>, vector<2x256xf32>
      %c0_147 = arith.constant 0 : index
      %c82_148 = arith.constant 82 : index
      %449 = vector.load %arg6[%c0_147, %c82_148] : memref<2x512xf32, #tpu.memory_space<vmem>>, vector<2x256xf32>
      %450 = vector.broadcast %23 : f32 to vector<2x256xf32>
      %451 = arith.mulf %450, %448 : vector<2x256xf32>
      %452 = vector.broadcast %72 : f32 to vector<2x256xf32>
      %453 = arith.mulf %452, %449 : vector<2x256xf32>
      %454 = arith.addf %451, %453 : vector<2x256xf32>
      %c0_149 = arith.constant 0 : index
      %c98 = arith.constant 98 : index
      %455 = vector.load %arg5[%c0_149, %c98] : memref<2x512xf32, #tpu.memory_space<vmem>>, vector<2x256xf32>
      %c0_150 = arith.constant 0 : index
      %c98_151 = arith.constant 98 : index
      %456 = vector.load %arg6[%c0_150, %c98_151] : memref<2x512xf32, #tpu.memory_space<vmem>>, vector<2x256xf32>
      %457 = vector.broadcast %30 : f32 to vector<2x256xf32>
      %458 = arith.mulf %457, %455 : vector<2x256xf32>
      %459 = vector.broadcast %79 : f32 to vector<2x256xf32>
      %460 = arith.mulf %459, %456 : vector<2x256xf32>
      %461 = arith.addf %458, %460 : vector<2x256xf32>
      %c0_152 = arith.constant 0 : index
      %c114 = arith.constant 114 : index
      %462 = vector.load %arg5[%c0_152, %c114] : memref<2x512xf32, #tpu.memory_space<vmem>>, vector<2x256xf32>
      %c0_153 = arith.constant 0 : index
      %c114_154 = arith.constant 114 : index
      %463 = vector.load %arg6[%c0_153, %c114_154] : memref<2x512xf32, #tpu.memory_space<vmem>>, vector<2x256xf32>
      %464 = vector.broadcast %37 : f32 to vector<2x256xf32>
      %465 = arith.mulf %464, %462 : vector<2x256xf32>
      %466 = vector.broadcast %86 : f32 to vector<2x256xf32>
      %467 = arith.mulf %466, %463 : vector<2x256xf32>
      %468 = arith.addf %465, %467 : vector<2x256xf32>
      %c0_155 = arith.constant 0 : index
      %c130 = arith.constant 130 : index
      %469 = vector.load %arg5[%c0_155, %c130] : memref<2x512xf32, #tpu.memory_space<vmem>>, vector<2x256xf32>
      %c0_156 = arith.constant 0 : index
      %c130_157 = arith.constant 130 : index
      %470 = vector.load %arg6[%c0_156, %c130_157] : memref<2x512xf32, #tpu.memory_space<vmem>>, vector<2x256xf32>
      %471 = vector.broadcast %44 : f32 to vector<2x256xf32>
      %472 = arith.mulf %471, %469 : vector<2x256xf32>
      %473 = vector.broadcast %93 : f32 to vector<2x256xf32>
      %474 = arith.mulf %473, %470 : vector<2x256xf32>
      %475 = arith.addf %472, %474 : vector<2x256xf32>
      %c0_158 = arith.constant 0 : index
      %c146 = arith.constant 146 : index
      %476 = vector.load %arg5[%c0_158, %c146] : memref<2x512xf32, #tpu.memory_space<vmem>>, vector<2x256xf32>
      %c0_159 = arith.constant 0 : index
      %c146_160 = arith.constant 146 : index
      %477 = vector.load %arg6[%c0_159, %c146_160] : memref<2x512xf32, #tpu.memory_space<vmem>>, vector<2x256xf32>
      %478 = vector.broadcast %51 : f32 to vector<2x256xf32>
      %479 = arith.mulf %478, %476 : vector<2x256xf32>
      %480 = vector.broadcast %100 : f32 to vector<2x256xf32>
      %481 = arith.mulf %480, %477 : vector<2x256xf32>
      %482 = arith.addf %479, %481 : vector<2x256xf32>
      %c0_161 = arith.constant 0 : index
      %c162 = arith.constant 162 : index
      %483 = vector.load %arg5[%c0_161, %c162] : memref<2x512xf32, #tpu.memory_space<vmem>>, vector<2x256xf32>
      %c0_162 = arith.constant 0 : index
      %c162_163 = arith.constant 162 : index
      %484 = vector.load %arg6[%c0_162, %c162_163] : memref<2x512xf32, #tpu.memory_space<vmem>>, vector<2x256xf32>
      %485 = vector.broadcast %58 : f32 to vector<2x256xf32>
      %486 = arith.mulf %485, %483 : vector<2x256xf32>
      %487 = vector.broadcast %107 : f32 to vector<2x256xf32>
      %488 = arith.mulf %487, %484 : vector<2x256xf32>
      %489 = arith.addf %486, %488 : vector<2x256xf32>
      %c0_164 = arith.constant 0 : index
      %c178 = arith.constant 178 : index
      %490 = vector.load %arg5[%c0_164, %c178] : memref<2x512xf32, #tpu.memory_space<vmem>>, vector<2x256xf32>
      %c0_165 = arith.constant 0 : index
      %c178_166 = arith.constant 178 : index
      %491 = vector.load %arg6[%c0_165, %c178_166] : memref<2x512xf32, #tpu.memory_space<vmem>>, vector<2x256xf32>
      %492 = vector.broadcast %65 : f32 to vector<2x256xf32>
      %493 = arith.mulf %492, %490 : vector<2x256xf32>
      %494 = vector.broadcast %114 : f32 to vector<2x256xf32>
      %495 = arith.mulf %494, %491 : vector<2x256xf32>
      %496 = arith.addf %493, %495 : vector<2x256xf32>
      %497 = arith.addf %454, %461 : vector<2x256xf32>
      %498 = arith.addf %468, %475 : vector<2x256xf32>
      %499 = arith.addf %482, %489 : vector<2x256xf32>
      %500 = arith.addf %497, %498 : vector<2x256xf32>
      %501 = arith.addf %499, %496 : vector<2x256xf32>
      %502 = arith.addf %500, %501 : vector<2x256xf32>
      %cst_167 = arith.constant 0.000000e+00 : f32
      %503 = vector.broadcast %cst_167 : f32 to vector<2x256xf32>
      %504 = arith.select %447, %502, %503 : vector<2x256xi1>, vector<2x256xf32>
      %c-3_i32 = arith.constant -3 : i32
      %505 = vector.broadcast %c-3_i32 : i32 to vector<2x256xi32>
      %506 = arith.cmpi sge, %132, %505 : vector<2x256xi32>
      %c13_i32 = arith.constant 13 : i32
      %507 = vector.broadcast %c13_i32 : i32 to vector<2x256xi32>
      %508 = arith.cmpi slt, %132, %507 : vector<2x256xi32>
      %509 = arith.andi %506, %508 : vector<2x256xi1>
      %c0_168 = arith.constant 0 : index
      %c83_169 = arith.constant 83 : index
      %510 = vector.load %arg5[%c0_168, %c83_169] : memref<2x512xf32, #tpu.memory_space<vmem>>, vector<2x256xf32>
      %c0_170 = arith.constant 0 : index
      %c83_171 = arith.constant 83 : index
      %511 = vector.load %arg6[%c0_170, %c83_171] : memref<2x512xf32, #tpu.memory_space<vmem>>, vector<2x256xf32>
      %512 = vector.broadcast %24 : f32 to vector<2x256xf32>
      %513 = arith.mulf %512, %510 : vector<2x256xf32>
      %514 = vector.broadcast %73 : f32 to vector<2x256xf32>
      %515 = arith.mulf %514, %511 : vector<2x256xf32>
      %516 = arith.addf %513, %515 : vector<2x256xf32>
      %c0_172 = arith.constant 0 : index
      %c99 = arith.constant 99 : index
      %517 = vector.load %arg5[%c0_172, %c99] : memref<2x512xf32, #tpu.memory_space<vmem>>, vector<2x256xf32>
      %c0_173 = arith.constant 0 : index
      %c99_174 = arith.constant 99 : index
      %518 = vector.load %arg6[%c0_173, %c99_174] : memref<2x512xf32, #tpu.memory_space<vmem>>, vector<2x256xf32>
      %519 = vector.broadcast %31 : f32 to vector<2x256xf32>
      %520 = arith.mulf %519, %517 : vector<2x256xf32>
      %521 = vector.broadcast %80 : f32 to vector<2x256xf32>
      %522 = arith.mulf %521, %518 : vector<2x256xf32>
      %523 = arith.addf %520, %522 : vector<2x256xf32>
      %c0_175 = arith.constant 0 : index
      %c115 = arith.constant 115 : index
      %524 = vector.load %arg5[%c0_175, %c115] : memref<2x512xf32, #tpu.memory_space<vmem>>, vector<2x256xf32>
      %c0_176 = arith.constant 0 : index
      %c115_177 = arith.constant 115 : index
      %525 = vector.load %arg6[%c0_176, %c115_177] : memref<2x512xf32, #tpu.memory_space<vmem>>, vector<2x256xf32>
      %526 = vector.broadcast %38 : f32 to vector<2x256xf32>
      %527 = arith.mulf %526, %524 : vector<2x256xf32>
      %528 = vector.broadcast %87 : f32 to vector<2x256xf32>
      %529 = arith.mulf %528, %525 : vector<2x256xf32>
      %530 = arith.addf %527, %529 : vector<2x256xf32>
      %c0_178 = arith.constant 0 : index
      %c131 = arith.constant 131 : index
      %531 = vector.load %arg5[%c0_178, %c131] : memref<2x512xf32, #tpu.memory_space<vmem>>, vector<2x256xf32>
      %c0_179 = arith.constant 0 : index
      %c131_180 = arith.constant 131 : index
      %532 = vector.load %arg6[%c0_179, %c131_180] : memref<2x512xf32, #tpu.memory_space<vmem>>, vector<2x256xf32>
      %533 = vector.broadcast %45 : f32 to vector<2x256xf32>
      %534 = arith.mulf %533, %531 : vector<2x256xf32>
      %535 = vector.broadcast %94 : f32 to vector<2x256xf32>
      %536 = arith.mulf %535, %532 : vector<2x256xf32>
      %537 = arith.addf %534, %536 : vector<2x256xf32>
      %c0_181 = arith.constant 0 : index
      %c147 = arith.constant 147 : index
      %538 = vector.load %arg5[%c0_181, %c147] : memref<2x512xf32, #tpu.memory_space<vmem>>, vector<2x256xf32>
      %c0_182 = arith.constant 0 : index
      %c147_183 = arith.constant 147 : index
      %539 = vector.load %arg6[%c0_182, %c147_183] : memref<2x512xf32, #tpu.memory_space<vmem>>, vector<2x256xf32>
      %540 = vector.broadcast %52 : f32 to vector<2x256xf32>
      %541 = arith.mulf %540, %538 : vector<2x256xf32>
      %542 = vector.broadcast %101 : f32 to vector<2x256xf32>
      %543 = arith.mulf %542, %539 : vector<2x256xf32>
      %544 = arith.addf %541, %543 : vector<2x256xf32>
      %c0_184 = arith.constant 0 : index
      %c163 = arith.constant 163 : index
      %545 = vector.load %arg5[%c0_184, %c163] : memref<2x512xf32, #tpu.memory_space<vmem>>, vector<2x256xf32>
      %c0_185 = arith.constant 0 : index
      %c163_186 = arith.constant 163 : index
      %546 = vector.load %arg6[%c0_185, %c163_186] : memref<2x512xf32, #tpu.memory_space<vmem>>, vector<2x256xf32>
      %547 = vector.broadcast %59 : f32 to vector<2x256xf32>
      %548 = arith.mulf %547, %545 : vector<2x256xf32>
      %549 = vector.broadcast %108 : f32 to vector<2x256xf32>
      %550 = arith.mulf %549, %546 : vector<2x256xf32>
      %551 = arith.addf %548, %550 : vector<2x256xf32>
      %c0_187 = arith.constant 0 : index
      %c179 = arith.constant 179 : index
      %552 = vector.load %arg5[%c0_187, %c179] : memref<2x512xf32, #tpu.memory_space<vmem>>, vector<2x256xf32>
      %c0_188 = arith.constant 0 : index
      %c179_189 = arith.constant 179 : index
      %553 = vector.load %arg6[%c0_188, %c179_189] : memref<2x512xf32, #tpu.memory_space<vmem>>, vector<2x256xf32>
      %554 = vector.broadcast %66 : f32 to vector<2x256xf32>
      %555 = arith.mulf %554, %552 : vector<2x256xf32>
      %556 = vector.broadcast %115 : f32 to vector<2x256xf32>
      %557 = arith.mulf %556, %553 : vector<2x256xf32>
      %558 = arith.addf %555, %557 : vector<2x256xf32>
      %559 = arith.addf %516, %523 : vector<2x256xf32>
      %560 = arith.addf %530, %537 : vector<2x256xf32>
      %561 = arith.addf %544, %551 : vector<2x256xf32>
      %562 = arith.addf %559, %560 : vector<2x256xf32>
      %563 = arith.addf %561, %558 : vector<2x256xf32>
      %564 = arith.addf %562, %563 : vector<2x256xf32>
      %cst_190 = arith.constant 0.000000e+00 : f32
      %565 = vector.broadcast %cst_190 : f32 to vector<2x256xf32>
      %566 = arith.select %509, %564, %565 : vector<2x256xi1>, vector<2x256xf32>
      %567 = arith.addf %194, %256 : vector<2x256xf32>
      %568 = arith.addf %318, %380 : vector<2x256xf32>
      %569 = arith.addf %442, %504 : vector<2x256xf32>
      %570 = arith.addf %567, %568 : vector<2x256xf32>
      %571 = arith.addf %569, %566 : vector<2x256xf32>
      %572 = arith.addf %570, %571 : vector<2x256xf32>
      %573 = arith.negf %572 : vector<2x256xf32>
      %574 = math.exp %573 : vector<2x256xf32>
      %cst_191 = arith.constant 1.000000e+00 : f32
      %575 = vector.broadcast %cst_191 : f32 to vector<2x256xf32>
      %576 = arith.addf %575, %574 : vector<2x256xf32>
      %577 = arith.divf %575, %576 : vector<2x256xf32>
      %c0_192 = arith.constant 0 : index
      %c0_193 = arith.constant 0 : index
      %c0_194 = arith.constant 0 : index
      %578 = vector.load %arg4[%c0_192, %c0_193, %c0_194] : memref<2x1x256xf32, #tpu.memory_space<vmem>>, vector<2x1x256xf32>
      %579 = vector.shape_cast %578 : vector<2x1x256xf32> to vector<2x256xf32>
      %580 = vector.shape_cast %577 : vector<2x256xf32> to vector<2x1x256xf32>
      tpu.vector_store %arg4[%c0_192, %c0_193, %c0_194], %580 {strides = array<i32>} : memref<2x1x256xf32, #tpu.memory_space<vmem>>, vector<2x1x256xf32>,
    } else {
    }
    return
  }
  func.func @transform_0(%arg0: i32, %arg1: i32) -> (i32, i32, i32) {
    %c0_i32 = arith.constant 0 : i32
    %c0_i32_0 = arith.constant 0 : i32
    return %arg0, %arg1, %c0_i32 : i32, i32, i32
  }
  func.func @transform_1(%arg0: i32, %arg1: i32) -> i32 {
    %c0_i32 = arith.constant 0 : i32
    %c0_i32_0 = arith.constant 0 : i32
    return %c0_i32 : i32
  }
  func.func @transform_2(%arg0: i32, %arg1: i32) -> (i32, i32, i32) {
    %c0_i32 = arith.constant 0 : i32
    %c0_i32_0 = arith.constant 0 : i32
    %c0_i32_1 = arith.constant 0 : i32
    return %arg0, %c0_i32, %c0_i32_0 : i32, i32, i32
  }
}

</mosaic_0001>

<bundles_post_ra>
// kernel: tpu_custom_call.1
= control target key start
LH: loop header
LB: loop body
LE: loop exit
PB: predicated region body
PF: predicated region fallthrough
CT: control target
= control target key end

     0   :  { %7 = vsyncpa [#allocation5], 0  ;;  %s2060_s0 = inlined_call_operand.hbm [shape: f32[2,4,256], index: 0, kind: input, shape index: {}]   ;;  %s2061_s1 = inlined_call_operand.vmem [shape: f32[98], index: 1, kind: input, shape index: {}]   ;;  %s2062_s2 = inlined_call_operand.hbm [shape: f32[2,1,256], index: 2, kind: output, shape index: {}]  }
   0x1   :  { %8 = vsyncpa [#allocation7], 0 }
   0x2   :  { %9 = vsyncpa [#allocation6], 0  ;;  %s1438_s9 = smov [#allocation4]   ;;  %s28_s13 = sshll.u32 %s2061_s1, 4  ;;  %s29_s13 = int_to_ptr.vmem [resolvable:$true] %s28_s13 }
   0x3   :  { %s15_s10 = sshll.u32 %s1438_s9, 4  ;;  %s16_s10 = int_to_ptr.vmem [resolvable:$true] %s15_s10 }
   0x4   :  { %s1388_s14 = scalar_lea.vmem %s16_s10, 256  ;;  %p1393_p1 = scmp.lt.s32.totalorder %s16_s10, %s16_s10 }
   0x5   :  { %p1389_p0 = scmp.ne.s32.totalorder %s16_s10, %s1388_s14  ;;  %p1394_p2 = scmp.lt.s32.totalorder %s1388_s14, %s1388_s14 }
   0x7   :  { %p1395_p3 = por %p1394_p2, %p1393_p1 }
   0x9   :  { %p1396_p4 = pnand %p1395_p3, %p1389_p0 }
   0xb   :  { %1399 = shalt.err (!%p1396_p4)
}
   0xc   :  { %s1439_s15 = smov 128   ;;  %s1440_s16 = smov 8  }
   0xd   :  { %21 = dma.hbm_to_vmem [thread:$0]  %s2060_s0, 256, %s16_s10, [#allocation5], %s1439_s15, %s1439_s15, %s1440_s16  }
   0xe   :  { %s1400_s19 = scalar_lea.vmem %s29_s13, 16  ;;  %p1405_p6 = scmp.lt.s32.totalorder %s29_s13, %s29_s13 }
   0xf   :  { %p1401_p5 = scmp.ne.s32.totalorder %s29_s13, %s1400_s19  ;;  %p1406_p7 = scmp.lt.s32.totalorder %s1400_s19, %s1400_s19 }
  0x11   :  { %p1407_p8 = por %p1406_p7, %p1405_p6 }
  0x13   :  { %p1408_p9 = pnand %p1407_p8, %p1401_p5 }
  0x15   :  { %1411 = shalt.err (!%p1408_p9)
}
  0x16   :  { %s1441_s1 = smov [#allocation8]  }
  0x17   :  { %31 = dma.vmem_to_smem %s29_s13, 16, %s1441_s1, [#allocation7]  }
  0x18   :  { %1432 = dma.done.wait [#allocation5], 256  }
  0x19   :  { %1433 = vsyncadd [#allocation5], 4294967040 }
  0x1a   :  { %1434 = dma.done.wait [#allocation7], 16  }
  0x1b   :  { %1435 = vsyncadd [#allocation7], 4294967280 }
  0x1c   :  { %38 = sfence }
  0x1d   :  { %v39_v0 = vld [vmem:[#allocation4] sm:$0xff]  ;;  %v40_v1 = vld [vmem:[#allocation4 + $0x8] sm:$0xff]  ;;  %vm47_vm0 = vcmask 1043456   ;;  %v116_v2 = vlaneseq  ;;  %s1487_s0 = sld [smem:[#allocation8 + $0x16]]  ;;  %v1442_v57 = vmov 1983009808  }
  0x1e   :  { %v43_v3 = vcombine.high %v39_v0, %v39_v0  ;;  %v44_v4 = vcombine.high %v40_v1, %v40_v1  ;;  %v48_v5 = vsel %vm47_vm0, %v39_v0, 0.0  ;;  %v62_v6 = vsel %vm47_vm0, %v40_v1, 0.0  ;;  %s1489_s20 = sld [smem:[#allocation8 + $0x47]] }
  0x1f   :  { %v49_v7 = vrot.slane %v48_v5, 4  ;;  %v63_v8 = vrot.slane %v62_v6, 4  ;;  %v76_v9 = vsel %vm47_vm0, %v39_v0, -inf  ;;  %v90_v10 = vsel %vm47_vm0, %v40_v1, -inf  ;;  %s1491_s21 = sld [smem:[#allocation8 + $0x15]] }
  0x20   :  { %v55_v11 = vsel %vm47_vm0, %v43_v3, 0.0  ;;  %v69_v12 = vsel %vm47_vm0, %v44_v4, 0.0  ;;  %v77_v13 = vrot.slane %v76_v9, 4  ;;  %v83_v14 = vsel %vm47_vm0, %v43_v3, -inf  ;;  %s1496_s22 = sld [smem:[#allocation8 + $0x46]] }
  0x21   :  { %v50_v15 = vadd.f32 %v49_v7, %v48_v5  ;;  %v56_v16 = vrot.slane %v55_v11, 4  ;;  %v64_v17 = vadd.f32 %v63_v8, %v62_v6  ;;  %v70_v18 = vrot.slane %v69_v12, 4  ;;  %s1498_s23 = sld [smem:[#allocation8 + $0x24]] }
  0x22   :  { %v78_v19 = vmax.f32 %v76_v9, %v77_v13  ;;  %v84_v20 = vrot.slane %v83_v14, 4  ;;  %v91_v21 = vrot.slane %v90_v10, 4  ;;  %v97_v22 = vsel %vm47_vm0, %v44_v4, -inf  ;;  %s1500_s24 = sld [smem:[#allocation8 + $0x55]] }
  0x23   :  { %v51_v23 = vrot.slane %v50_v15, 2  ;;  %v57_v24 = vadd.f32 %v56_v16, %v55_v11  ;;  %v65_v25 = vrot.slane %v64_v17, 2  ;;  %v71_v26 = vadd.f32 %v70_v18, %v69_v12  ;;  %s1502_s25 = sld [smem:[#allocation8 + $0x23]] }
  0x24   :  { %v79_v27 = vrot.slane %v78_v19, 2  ;;  %v85_v28 = vmax.f32 %v83_v14, %v84_v20  ;;  %v92_v29 = vmax.f32 %v90_v10, %v91_v21  ;;  %v98_v30 = vrot.slane %v97_v22, 4  ;;  %s1507_s26 = sld [smem:[#allocation8 + $0x54]] }
  0x25   :  { %v52_v31 = vadd.f32 %v51_v23, %v50_v15  ;;  %v58_v32 = vrot.slane %v57_v24, 2  ;;  %v66_v33 = vadd.f32 %v65_v25, %v64_v17  ;;  %v72_v34 = vrot.slane %v71_v26, 2  ;;  %s1509_s27 = sld [smem:[#allocation8 + $0x25]] }
  0x26   :  { %v80_v35 = vmax.f32 %v78_v19, %v79_v27  ;;  %v86_v36 = vrot.slane %v85_v28, 2  ;;  %v93_v37 = vrot.slane %v92_v29, 2  ;;  %v99_v38 = vmax.f32 %v97_v22, %v98_v30  ;;  %s1513_s28 = sld [smem:[#allocation8 + $0x56]] }
  0x27   :  { %v53_v39 = vrot.slane %v52_v31, 1  ;;  %v59_v40 = vadd.f32 %v58_v32, %v57_v24  ;;  %v67_v41 = vrot.slane %v66_v33, 1  ;;  %v73_v42 = vadd.f32 %v72_v34, %v71_v26  ;;  %s1517_s29 = sld [smem:[#allocation8 + $0x17]] }
  0x28   :  { %v81_v43 = vrot.slane %v80_v35, 1  ;;  %v87_v44 = vmax.f32 %v85_v28, %v86_v36  ;;  %v94_v45 = vmax.f32 %v92_v29, %v93_v37  ;;  %v100_v46 = vrot.slane %v99_v38, 2  ;;  %s1519_s30 = sld [smem:[#allocation8 + $0x48]] }
  0x29   :  { %v54_v47 = vadd.f32 %v53_v39, %v52_v31  ;;  %v60_v48 = vrot.slane %v59_v40, 1  ;;  %v68_v49 = vadd.f32 %v67_v41, %v66_v33  ;;  %v74_v50 = vrot.slane %v73_v42, 1  ;;  %s1521_s3 = sld [smem:[#allocation8 + $0x27]] }
  0x2a   :  { %v82_v51 = vmax.f32 %v80_v35, %v81_v43  ;;  %v88_v52 = vrot.slane %v87_v44, 1  ;;  %v95_v53 = vrot.slane %v94_v45, 1  ;;  %v101_v54 = vmax.f32 %v99_v38, %v100_v46  ;;  %s1523_s4 = sld [smem:[#allocation8 + $0x58]] }
  0x2b   :  { %v61_v55 = vadd.f32 %v60_v48, %v59_v40  ;;  %v75_v56 = vadd.f32 %v74_v50, %v73_v42  ;;  %v114_v58 = vunpack.c.l.s4 %v1442_v57  ;;  %v1494_v59 = vshrl.u32 %v116_v2, 7  ;;  %s1525_s5 = sld [smem:[#allocation8 + $0x19]] }
  0x2c   :  { %v89_v60 = vmax.f32 %v87_v44, %v88_v52  ;;  %v96_v61 = vmax.f32 %v94_v45, %v95_v53  ;;  %v102_v62 = vrot.slane %v101_v54, 1  ;;  %v1443_v6 = vmov 0.0   ;;  %s1527_s6 = sld [smem:[#allocation8 + $0x4a]] }
  0x2d   :  { %v112_v63 = vcombine.low %v54_v47, %v61_v55  ;;  %v115_v0 = vunpack.c.0.s8 %v114_v58  ;;  %v120_v1 = vcombine.low %v68_v49, %v75_v56  ;;  %247 = vst [vmem:[#allocation2] sm:$0x3] %v1443_v6  ;;  %249 = vst [vmem:[#allocation3] sm:$0x3] %v1443_v6  ;;  %vm133_vm1 = vcmask 1041409   ;;  %s1529_s7 = sld [smem:[#allocation8 + $0x28]] }
  0x2e   :  { %v103_v3 = vmax.f32 %v101_v54, %v102_v62  ;;  %v147_v4 = vcombine.low %v82_v51, %v89_v60  ;;  %248 = vst [vmem:[#allocation2 + $0x6] sm:$0x3] %v1443_v6  ;;  %250 = vst [vmem:[#allocation3 + $0x6] sm:$0x3] %v1443_v6  ;;  %vm135_vm2 = vcmask 1043459   ;;  %vm137_vm3 = vcmask 1045509  }
  0x2f   :  { %v1505_v5 = vsub.s32 %v115_v0, %v1494_v59  ;;  %vm139_vm4 = vcmask 1047559   ;;  %s1531_s8 = sld [smem:[#allocation8 + $0x59]]  ;;  %v517_v22 = vstv %s1487_s0  ;;  %v399_v23 = vstv %s1491_s21  ;;  %s1444_s0 = smov 112  }
  0x30   :  { %v155_v7 = vcombine.low %v96_v61, %v103_v3  ;;  %s1533_s9 = sld [smem:[#allocation8 + $0x1a]]  ;;  %v527_v24 = vstv %s1498_s23  ;;  %v411_v25 = vstv %s1502_s25  ;;  %v519_v26 = vstv %s1489_s20 }
  0x31   :  { %v119_v8 = vrot.slane %v112_v63, %v1505_v5  ;;  %v127_v9 = vrot.slane %v120_v1, %v1505_v5  ;;  %v154_v10 = vrot.slane %v147_v4, %v1505_v5  ;;  %s1535_s10 = sld [smem:[#allocation8 + $0x4b]]  ;;  %v401_v27 = vstv %s1496_s22 }
  0x32   :  { %v162_v11 = vrot.slane %v155_v7, %v1505_v5  ;;  %s1537_s11 = sld [smem:[#allocation8 + $0x26]]  ;;  %v529_v28 = vstv %s1500_s24  ;;  %v413_v29 = vstv %s1507_s26  ;;  %v640_v32 = vstv %s1509_s27 }
  0x33   :  { %v132_v12 = vrot.slane %v127_v9, 7  ;;  %s1539_s12 = sld [smem:[#allocation8 + $0x57]]  ;;  %v642_v33 = vstv %s1513_s28  ;;  %v630_v34 = vstv %s1517_s29  ;;  %v632_v45 = vstv %s1519_s30 }
  0x34   :  { %v165_v13 = vrot.slane %v162_v11, 7  ;;  %s1545_s13 = sld [smem:[#allocation8 + $0x18]]  ;;  %v868_v51 = vstv %s1521_s3  ;;  %v870_v55 = vstv %s1523_s4  ;;  %v858_v56 = vstv %s1525_s5 }
  0x35   :  { %v134_v14 = vsel %vm133_vm1, %v132_v12, %v119_v8  ;;  %s1551_s14 = sld [smem:[#allocation8 + $0x49]]  ;;  %v860_v57 = vstv %s1527_s6  ;;  %v981_v62 = vstv %s1529_s7  ;;  %v983_v3 = vstv %s1531_s8 }
  0x36   :  { %v136_v15 = vsel %vm135_vm2, %v132_v12, %v134_v14  ;;  %v166_v16 = vsel %vm133_vm1, %v165_v13, %v154_v10  ;;  %s1560_s15 = sld [smem:[#allocation8 + $0x2b]]  ;;  %v971_v4 = vstv %s1533_s9  ;;  %vm425_vm5 = vcmask 916480  }
  0x37   :  { %v138_v17 = vsel %vm137_vm3, %v132_v12, %v136_v15  ;;  %v167_v18 = vsel %vm135_vm2, %v165_v13, %v166_v16  ;;  %s1570_s16 = sld [smem:[#allocation8 + $0x5c]]  ;;  %v973_v6 = vstv %s1535_s10  ;;  %vm447_vm6 = vcmask 785408  }
  0x38   :  { %v140_v19 = vsel %vm139_vm4, %v132_v12, %v138_v17  ;;  %v168_v20 = vsel %vm137_vm3, %v165_v13, %v167_v18  ;;  %s1576_s17 = sld [smem:[#allocation8 + $0x2a]]  ;;  %v755_v7 = vstv %s1537_s11  ;;  %vm462_vm7 = vcmask 523264  }
  0x39   :  { %142 = vst [vmem:[#allocation2 + $0x2] sm:$0xf] %v140_v19  ;;  %v169_v21 = vsel %vm139_vm4, %v165_v13, %v168_v20  ;;  %s1579_s18 = sld [smem:[#allocation8 + $0x5b]]  ;;  %v757_v11 = vstv %s1539_s12  ;;  %vm602_vm12 = vcmask 408576   ;;  %vm715_vm15 = vcmask 400384  }
  0x3a   :  { %171 = vst [vmem:[#allocation3 + $0x2] sm:$0xf] %v169_v21  ;;  %s1581_s19 = sld [smem:[#allocation8 + $0x2e]]  ;;  %v745_v16 = vstv %s1545_s13  ;;  %vm943_vm3 = vcmask 384000   ;;  %vm1056_vm4 = vcmask 375808   ;;  %vm1169_vm9 = vcmask 367616  }
  0x3b   :  { %s1587_s1 = sld [smem:[#allocation8 + $0x5f]]  ;;  %v747_v18 = vstv %s1551_s14  ;;  %vm2063_vm1 = vcmask 416768  }
  0x3c   :  { %s1593_s20 = sld [smem:[#allocation8 + $0x2c]]  ;;  %v532_v19 = vstv %s1560_s15  ;;  %vm2064_vm2 = vmmov %vm2063_vm1 }
  0x3d   :  { %s1597_s21 = sld [smem:[#allocation8 + $0x5d]] }
  0x3e   :  { %s1599_s22 = sld [smem:[#allocation8 + $0x1b]] }
  0x3f   :  { %s1604_s23 = sld [smem:[#allocation8 + $0x4c]] }
  0x40   :  { %v1553_v30 = vld [vmem:[#allocation2] sm:$0x3f]  ;;  %s1611_s24 = sld [smem:[#allocation8 + $0x2f]] }
  0x41   :  { %v1555_v31 = vld [vmem:[#allocation2 + $0x2] sm:$0x3f]  ;;  %v1562_v35 = vld [vmem:[#allocation3] sm:$0x3f]  ;;  %v518_v36 = vmul.f32 %v517_v22, %v1553_v30  ;;  %v400_v37 = vmul.f32 %v399_v23, %v1553_v30  ;;  %v631_v50 = vmul.f32 %v630_v34, %v1553_v30  ;;  %s1615_s25 = sld [smem:[#allocation8 + $0x60]]  ;;  %v534_v23 = vstv %s1570_s16  ;;  %s1445_s16 = smov 96  }
  0x42   :  { %v1566_v38 = vld [vmem:[#allocation3 + $0x2] sm:$0x3f]  ;;  %v528_v39 = vmul.f32 %v527_v24, %v1555_v31  ;;  %v412_v40 = vmul.f32 %v411_v25, %v1555_v31  ;;  %v520_v41 = vmul.f32 %v519_v26, %v1562_v35  ;;  %v402_v42 = vmul.f32 %v401_v27, %v1562_v35  ;;  %s1618_s26 = sld [smem:[#allocation8 + $0x2d]]  ;;  %v743_v15 = vld [vmem:[#allocation2 + $0x2] sm:$0xf] }
  0x43   :  { %v530_v43 = vmul.f32 %v529_v28, %v1566_v38  ;;  %v414_v44 = vmul.f32 %v413_v29, %v1566_v38  ;;  %v641_v48 = vmul.f32 %v640_v32, %v1555_v31  ;;  %v643_v49 = vmul.f32 %v642_v33, %v1566_v38  ;;  %s1623_s27 = sld [smem:[#allocation8 + $0x5e]]  ;;  %v744_v17 = vld [vmem:[#allocation3 + $0x2] sm:$0xf] }
  0x44   :  { %v521_v46 = vadd.f32 %v520_v41, %v518_v36  ;;  %v403_v47 = vadd.f32 %v402_v42, %v400_v37  ;;  %v633_v54 = vmul.f32 %v632_v45, %v1562_v35  ;;  %v869_v60 = vmul.f32 %v868_v51, %v1555_v31  ;;  %s1630_s28 = sld [smem:[#allocation8 + $0x29]] }
  0x45   :  { %v531_v52 = vadd.f32 %v530_v43, %v528_v39  ;;  %v415_v53 = vadd.f32 %v414_v44, %v412_v40  ;;  %v644_v58 = vadd.f32 %v643_v49, %v641_v48  ;;  %v871_v61 = vmul.f32 %v870_v55, %v1566_v38  ;;  %s1633_s29 = sld [smem:[#allocation8 + $0x5a]] }
  0x46   :  { %545 = vrot.lane.b32.xlu1 %v521_v46, %s1444_s0  ;;  %430 = vrot.lane.b32.xlu0 %v403_v47, %s1444_s0  ;;  %v634_v63 = vadd.f32 %v633_v54, %v631_v50  ;;  %v859_v0 = vmul.f32 %v858_v56, %v1555_v31  ;;  %v861_v1 = vmul.f32 %v860_v57, %v1566_v38  ;;  %s1636_s30 = sld [smem:[#allocation8 + $0x30]]  ;;  %v416_v27 = vstv %s1576_s17 }
  0x47   :  { %v872_v8 = vadd.f32 %v871_v61, %v869_v60  ;;  %v982_v9 = vmul.f32 %v981_v62, %v1555_v31  ;;  %v984_v10 = vmul.f32 %v983_v3, %v1566_v38  ;;  %v972_v13 = vmul.f32 %v971_v4, %v1555_v31  ;;  %s1641_s3 = sld [smem:[#allocation8 + $0x61]] }
  0x48   :  { %v862_v12 = vadd.f32 %v861_v1, %v859_v0  ;;  %v974_v14 = vmul.f32 %v973_v6, %v1566_v38  ;;  %v756_v20 = vmul.f32 %v755_v7, %v1555_v31  ;;  %v758_v21 = vmul.f32 %v757_v11, %v1566_v38  ;;  %s1645_s4 = sld [smem:[#allocation8 + $0x8]] }
  0x49   :  { %v746_v22 = vmul.f32 %v745_v16, %v743_v15  ;;  %v985_v24 = vadd.f32 %v984_v10, %v982_v9  ;;  %v748_v26 = vmul.f32 %v747_v18, %v744_v17  ;;  %v418_v28 = vstv %s1579_s18  ;;  %s1649_s5 = sld [smem:[#allocation8 + $0x39]] }
  0x4a   :  { %552 = vrot.lane.b32.xlu1 %v531_v52, %s1444_s0  ;;  %437 = vrot.lane.b32.xlu0 %v415_v53, %s1444_s0  ;;  %v975_v25 = vadd.f32 %v974_v14, %v972_v13  ;;  %v533_v29 = vmul.f32 %v532_v19, %v1555_v31  ;;  %v535_v32 = vmul.f32 %v534_v23, %v1566_v38  ;;  %s1653_s6 = sld [smem:[#allocation8 + $0xb]]  ;;  %v873_v34 = vstv %s1581_s19 }
  0x4b   :  { %v759_v33 = vadd.f32 %v758_v21, %v756_v20  ;;  %v875_v36 = vstv %s1587_s1  ;;  %v645_v37 = vstv %s1593_s20  ;;  %s1658_s7 = sld [smem:[#allocation8 + $0x3c]]  ;;  %v749_v39 = vadd.f32 %v748_v26, %v746_v22 }
  0x4c   :  { %v417_v40 = vmul.f32 %v416_v27, %v1555_v31  ;;  %v419_v41 = vmul.f32 %v418_v28, %v1566_v38  ;;  %s1664_s8 = sld [smem:[#allocation8 + $0x7]]  ;;  %v647_v42 = vstv %s1597_s21  ;;  %v536_v43 = vadd.f32 %v535_v32, %v533_v29 }
  0x4d   :  { %s1667_s9 = sld [smem:[#allocation8 + $0x38]]  ;;  %v874_v44 = vmul.f32 %v873_v34, %v1555_v31  ;;  %v876_v45 = vmul.f32 %v875_v36, %v1566_v38  ;;  %v646_v46 = vmul.f32 %v645_v37, %v1555_v31  ;;  %v1084_v47 = vstv %s1599_s22 }
  0x4e   :  { %665 = vrot.lane.b32.xlu1 %v644_v58, %s1444_s0  ;;  %658 = vrot.lane.b32.xlu0 %v634_v63, %s1444_s0  ;;  %s1672_s10 = sld [smem:[#allocation8 + $0xa]]  ;;  %v1086_v48 = vstv %s1604_s23  ;;  %v986_v49 = vstv %s1611_s24  ;;  %v420_v51 = vadd.f32 %v419_v41, %v417_v40  ;;  %v648_v52 = vmul.f32 %v647_v42, %v1566_v38 }
  0x4f   :  { %v988_v50 = vstv %s1615_s25  ;;  %s1678_s11 = sld [smem:[#allocation8 + $0x3b]]  ;;  %v760_v53 = vstv %s1618_s26  ;;  %v762_v54 = vstv %s1623_s27  ;;  %v1085_v55 = vmul.f32 %v1084_v47, %v1555_v31 }
  0x50   :  { %s1685_s12 = sld [smem:[#allocation8 + $0x9]]  ;;  %v1087_v56 = vmul.f32 %v1086_v48, %v1566_v38  ;;  %v987_v57 = vmul.f32 %v986_v49, %v1555_v31  ;;  %v989_v58 = vmul.f32 %v988_v50, %v1566_v38  ;;  %v761_v60 = vmul.f32 %v760_v53, %v1555_v31 }
  0x51   :  { %s1687_s13 = sld [smem:[#allocation8 + $0x3a]]  ;;  %v763_v61 = vmul.f32 %v762_v54, %v1566_v38  ;;  %v1094_v62 = vstv %s1630_s28  ;;  %v1096_v63 = vstv %s1633_s29  ;;  %v877_v0 = vadd.f32 %v876_v45, %v874_v44 }
  0x52   :  { %893 = vrot.lane.b32.xlu1 %v872_v8, %s1444_s0  ;;  %886 = vrot.lane.b32.xlu0 %v862_v12, %s1444_s0  ;;  %s1693_s14 = sld [smem:[#allocation8 + $0x1d]]  ;;  %v649_v1 = vadd.f32 %v648_v52, %v646_v46  ;;  %v1099_v3 = vstv %s1636_s30  ;;  %v1101_v4 = vstv %s1641_s3  ;;  %v1095_v6 = vmul.f32 %v1094_v62, %v1555_v31 }
  0x53   :  { %s1699_s15 = sld [smem:[#allocation8 + $0x4e]]  ;;  %v1097_v7 = vmul.f32 %v1096_v63, %v1566_v38  ;;  %v1088_v8 = vadd.f32 %v1087_v56, %v1085_v55  ;;  %v990_v9 = vadd.f32 %v989_v58, %v987_v57  ;;  %v764_v10 = vadd.f32 %v763_v61, %v761_v60 }
  0x54   :  { %s1703_s17 = sld [smem:[#allocation8 + $0x1c]]  ;;  %v389_v11 = vstv %s1664_s8  ;;  %v1100_v12 = vmul.f32 %v1099_v3, %v1555_v31  ;;  %v1102_v13 = vmul.f32 %v1101_v4, %v1566_v38  ;;  %v391_v14 = vstv %s1667_s9 }
  0x55   :  { %s1707_s18 = sld [smem:[#allocation8 + $0x4d]]  ;;  %v507_v16 = vstv %s1645_s4  ;;  %v509_v17 = vstv %s1649_s5  ;;  %v1098_v20 = vadd.f32 %v1097_v7, %v1095_v6  ;;  %v390_v21 = vmul.f32 %v389_v11, %v1553_v30 }
  0x56   :  { %1006 = vrot.lane.b32.xlu1 %v985_v24, %s1444_s0  ;;  %999 = vrot.lane.b32.xlu0 %v975_v25, %s1444_s0  ;;  %s1711_s19 = sld [smem:[#allocation8 + $0x1e]]  ;;  %v392_v24 = vmul.f32 %v391_v14, %v1562_v35  ;;  %v620_v25 = vstv %s1685_s12  ;;  %v508_v37 = vmul.f32 %v507_v16, %v1553_v30  ;;  %v1103_v42 = vadd.f32 %v1102_v13, %v1100_v12 }
  0x57   :  { %s1714_s1 = sld [smem:[#allocation8 + $0x4f]]  ;;  %v622_v28 = vstv %s1687_s13  ;;  %v621_v44 = vmul.f32 %v620_v25, %v1553_v30  ;;  %v850_v46 = vstv %s1658_s7  ;;  %v733_v58 = vstv %s1672_s10 }
  0x58   :  { %s1721_s20 = sld [smem:[#allocation8 + $0xc]]  ;;  %v522_v15 = vstv %s1693_s14  ;;  %v623_v45 = vmul.f32 %v622_v28, %v1562_v35  ;;  %v393_v47 = vadd.f32 %v392_v24, %v390_v21  ;;  %v851_v57 = vmul.f32 %v850_v46, %v1562_v35 }
  0x59   :  { %s1726_s21 = sld [smem:[#allocation8 + $0x3d]]  ;;  %v523_v18 = vmul.f32 %v522_v15, %v1555_v31  ;;  %v524_v19 = vstv %s1699_s15  ;;  %v735_v60 = vstv %s1678_s11  ;;  %v734_v7 = vmul.f32 %v733_v58, %v1553_v30 }
  0x5a   :  { %780 = vrot.lane.b32.xlu1 %v759_v33, %s1444_s0  ;;  %773 = vrot.lane.b32.xlu0 %v749_v39, %s1444_s0  ;;  %v525_v22 = vmul.f32 %v524_v19, %v1566_v38  ;;  %v406_v23 = vstv %s1703_s17  ;;  %s1733_s22 = sld [smem:[#allocation8 + $0x20]]  ;;  %v510_v39 = vmul.f32 %v509_v17, %v1562_v35  ;;  %v624_v61 = vadd.f32 %v623_v45, %v621_v44 }
  0x5b   :  { %v407_v26 = vmul.f32 %v406_v23, %v1555_v31  ;;  %v408_v27 = vstv %s1707_s18  ;;  %s1739_s23 = sld [smem:[#allocation8 + $0x51]]  ;;  %s1446_s18 = smov 64  }
  0x5c   :  { %v1744_v29 = vadd.f32 %v525_v22, %v523_v18  ;;  %v409_v32 = vmul.f32 %v408_v27, %v1566_v38  ;;  %v635_v33 = vstv %s1711_s19  ;;  %s1755_s24 = sld [smem:[#allocation8 + $0x21]]  ;;  %v511_v54 = vadd.f32 %v510_v39, %v508_v37 }
  0x5d   :  { %v636_v34 = vmul.f32 %v635_v33, %v1555_v31  ;;  %v637_v36 = vstv %s1714_s1  ;;  %s1332_s25 = sld [smem:[#allocation8 + $0x52]] }
  0x5e   :  { %566 = vrot.lane.b32.xlu1 %v536_v43, %s1445_s16  ;;  %452 = vrot.lane.b32.xlu0 %v420_v51, %s1445_s16  ;;  %v1752_v40 = vadd.f32 %v409_v32, %v407_v26  ;;  %v638_v41 = vmul.f32 %v637_v36, %v1566_v38  ;;  %v848_v43 = vstv %s1653_s6  ;;  %s1763_s26 = sld [smem:[#allocation8 + $0xd]]  ;;  %v961_v50 = vstv %s1721_s20 }
  0x5f   :  { %s1768_s27 = sld [smem:[#allocation8 + $0x3e]]  ;;  %v963_v51 = vstv %s1726_s21  ;;  %v849_v55 = vmul.f32 %v848_v43, %v1553_v30  ;;  %v962_v62 = vmul.f32 %v961_v50, %v1553_v30 }
  0x60   :  { %v1765_v48 = vadd.f32 %v638_v41, %v636_v34  ;;  %v863_v49 = vstv %s1733_s22  ;;  %s1281_s28 = sld [smem:[#allocation8 + $0x1f]]  ;;  %v964_v63 = vmul.f32 %v963_v51, %v1562_v35 }
  0x61   :  { %v864_v52 = vmul.f32 %v863_v49, %v1555_v31  ;;  %v865_v53 = vstv %s1739_s23  ;;  %s1330_s29 = sld [smem:[#allocation8 + $0x50]] }
  0x62   :  { %907 = vrot.lane.b32.xlu1 %v877_v0, %s1445_s16  ;;  %679 = vrot.lane.b32.xlu0 %v649_v1, %s1445_s16  ;;  %v866_v56 = vmul.f32 %v865_v53, %v1566_v38  ;;  %v976_v1 = vstv %s1755_s24  ;;  %s1284_s30 = sld [smem:[#allocation8 + $0x22]] }
  0x63   :  { %v977_v3 = vmul.f32 %v976_v1, %v1555_v31  ;;  %v978_v4 = vstv %s1332_s25  ;;  %s1333_s3 = sld [smem:[#allocation8 + $0x53]] }
  0x64   :  { %v1783_v0 = vadd.f32 %v866_v56, %v864_v52  ;;  %v979_v6 = vmul.f32 %v978_v4, %v1566_v38  ;;  %v1074_v13 = vstv %s1763_s26  ;;  %s1265_s4 = sld [smem:[#allocation8 + $0xf]] }
  0x65   :  { %v1076_v14 = vstv %s1768_s27  ;;  %v1075_v19 = vmul.f32 %v1074_v13, %v1553_v30  ;;  %s1314_s5 = sld [smem:[#allocation8 + $0x40]] }
  0x66   :  { %1112 = vrot.lane.b32.xlu1 %v1088_v8, %s1444_s0  ;;  %1020 = vrot.lane.b32.xlu0 %v990_v9, %s1445_s16  ;;  %v736_v8 = vmul.f32 %v735_v60, %v1562_v35  ;;  %v852_v9 = vadd.f32 %v851_v57, %v849_v55  ;;  %v1792_v11 = vadd.f32 %v979_v6, %v977_v3  ;;  %v750_v12 = vstv %s1281_s28  ;;  %s1264_s6 = sld [smem:[#allocation8 + $0xe]] }
  0x67   :  { %v751_v15 = vmul.f32 %v750_v12, %v1555_v31  ;;  %v752_v16 = vstv %s1330_s29  ;;  %s1313_s7 = sld [smem:[#allocation8 + $0x3f]] }
  0x68   :  { %v753_v17 = vmul.f32 %v752_v16, %v1566_v38  ;;  %v737_v18 = vadd.f32 %v736_v8, %v734_v7  ;;  %v1089_v22 = vstv %s1284_s30  ;;  %s1266_s8 = sld [smem:[#allocation8 + $0x10]] }
  0x69   :  { %v1090_v23 = vmul.f32 %v1089_v22, %v1555_v31  ;;  %v1091_v24 = vstv %s1333_s3  ;;  %s1315_s9 = sld [smem:[#allocation8 + $0x41]]  ;;  %s1447_s3 = smov 51  }
  0x6a   :  { %794 = vrot.lane.b32.xlu1 %v764_v10, %s1445_s16  ;;  %1119 = vrot.lane.b32.xlu0 %v1098_v20, %s1444_s0  ;;  %v965_v10 = vadd.f32 %v964_v63, %v962_v62  ;;  %v1077_v20 = vmul.f32 %v1076_v14, %v1562_v35  ;;  %v1802_v21 = vadd.f32 %v753_v17, %v751_v15  ;;  %v512_v28 = vstv %s1265_s4  ;;  %s1268_s10 = sld [smem:[#allocation8 + $0x12]]  ;;  %s1448_s4 = smov 49  }
  0x6b   :  { %v1092_v26 = vmul.f32 %v1091_v24, %v1566_v38  ;;  %v514_v32 = vstv %s1314_s5  ;;  %v513_v36 = vmul.f32 %v512_v28, %v1553_v30  ;;  %s1814_s11 = sld [smem:[#allocation8 + $0x13]]  ;;  %s1449_s5 = smov 46  }
  0x6c   :  { %v1078_v25 = vadd.f32 %v1077_v20, %v1075_v19  ;;  %v394_v33 = vstv %s1264_s6  ;;  %v515_v31 = vmul.f32 %v514_v32, %v1562_v35  ;;  %s1318_s12 = sld [smem:[#allocation8 + $0x44]]  ;;  %s1450_s6 = smov 50  }
  0x6d   :  { %v1807_v27 = vadd.f32 %v1092_v26, %v1090_v23  ;;  %v396_v34 = vstv %s1313_s7  ;;  %v395_v37 = vmul.f32 %v394_v33, %v1553_v30  ;;  %s1267_s13 = sld [smem:[#allocation8 + $0x11]]  ;;  %s1451_s7 = smov 47  }
  0x6e   :  { %1133 = vrot.lane.b32.xlu0 %v1103_v42, %s1445_s16  ;;  %422 = vrot.lane.b32.xlu1 %v393_v47, %s1444_s0  ;;  %v397_v38 = vmul.f32 %v396_v34, %v1562_v35  ;;  %v516_v41 = vadd.f32 %v515_v31, %v513_v36  ;;  %v625_v46 = vstv %s1266_s8  ;;  %s1316_s14 = sld [smem:[#allocation8 + $0x42]]  ;;  %s1452_s8 = smov 48  }
  0x6f   :  { %v627_v47 = vstv %s1315_s9  ;;  %v626_v55 = vmul.f32 %v625_v46, %v1553_v30  ;;  %s1270_s15 = sld [smem:[#allocation8 + $0x14]]  ;;  %s1453_s9 = smov 45  }
  0x70   :  { %v398_v43 = vadd.f32 %v397_v38, %v395_v37  ;;  %v628_v56 = vmul.f32 %v627_v47, %v1562_v35  ;;  %v853_v57 = vstv %s1268_s10  ;;  %s1319_s17 = sld [smem:[#allocation8 + $0x45]]  ;;  %s1455_s10 = smov [#allocation9]  }
  0x71   :  { %v854_v63 = vmul.f32 %v853_v57, %v1553_v30  ;;  %v966_v4 = vstv %s1814_s11  ;;  %s1299_s19 = sld [smem:[#allocation8 + $0x31]] }
  0x72   :  { %538 = vrot.lane.b32.xlu0 %v511_v54, %s1444_s0  ;;  %651 = vrot.lane.b32.xlu1 %v624_v61, %s1444_s0  ;;  %v629_v61 = vadd.f32 %v628_v56, %v626_v55  ;;  %v968_v6 = vstv %s1318_s12  ;;  %v967_v13 = vmul.f32 %v966_v4, %v1553_v30  ;;  %s1252_s1 = sld [smem:[#allocation8 + $0x2]] }
  0x73   :  { %v969_v14 = vmul.f32 %v968_v6, %v1562_v35  ;;  %v738_v16 = vstv %s1267_s13  ;;  %s1301_s20 = sld [smem:[#allocation8 + $0x33]] }
  0x74   :  { %v740_v17 = vstv %s1316_s14  ;;  %v739_v24 = vmul.f32 %v738_v16, %v1553_v30  ;;  %s1885_s21 = sld [smem:[#allocation8 + $0x1]] }
  0x75   :  { %v970_v22 = vadd.f32 %v969_v14, %v967_v13  ;;  %v1079_v46 = vstv %s1270_s15  ;;  %s1889_s22 = sld [smem:[#allocation8 + $0x32]] }
  0x76   :  { %879 = vrot.lane.b32.xlu0 %v852_v9, %s1444_s0  ;;  %992 = vrot.lane.b32.xlu1 %v965_v10, %s1444_s0  ;;  %v1081_v47 = vstv %s1319_s17  ;;  %v1080_v57 = vmul.f32 %v1079_v46, %v1553_v30  ;;  %s1891_s23 = sld [smem:[#allocation8 + $0x5]] }
  0x77   :  { %s1893_s24 = sld [smem:[#allocation8 + $0x36]] }
  0x78   :  { %s1897_s25 = sld [smem:[#allocation8 + $0x4]] }
  0x79   :  { %s1901_s26 = sld [smem:[#allocation8 + $0x35]] }
  0x7a   :  { %766 = vrot.lane.b32.xlu0 %v737_v18, %s1444_s0  ;;  %s1910_s27 = sld [smem:[#allocation8 + $0x3]] }
  0x7b   :  { %s1914_s28 = sld [smem:[#allocation8 + $0x34]] }
  0x7c   :  { %s1920_s29 = sld [smem:[#allocation8 + $0x6]] }
  0x7d   :  { %s1926_s30 = sld [smem:[#allocation8 + $0x37]] }
  0x7e   :  { %1105 = vrot.lane.b32.xlu0 %v1078_v25, %s1444_s0  ;;  %s1317_s0 = sld [smem:[#allocation8 + $0x43]]  ;;  %v741_v25 = vmul.f32 %v740_v17, %v1562_v35 }
  0x80   :  { %v742_v31 = vadd.f32 %v741_v25, %v739_v24 }
  0x84   :  { %v855_v58 = vstv %s1317_s0  ;;  %s1238_s0 = sshll.u32 %s1455_s10, 4  ;;  %s1239_s0 = int_to_ptr.vmem [resolvable:$true] %s1238_s0 }
  0x85   :  { %v856_v1 = vmul.f32 %v855_v58, %v1562_v35  ;;  %v1082_v58 = vmul.f32 %v1081_v47, %v1562_v35  ;;  %s1412_s11 = scalar_lea.vmem %s1239_s0, 64  ;;  %p1417_p11 = scmp.lt.s32.totalorder %s1239_s0, %s1239_s0 }
  0x86   :  { %p1413_p10 = scmp.ne.s32.totalorder %s1239_s0, %s1412_s11  ;;  %p1418_p12 = scmp.lt.s32.totalorder %s1412_s11, %s1412_s11 }
  0x87   :  { %v857_v10 = vadd.f32 %v856_v1, %v854_v63  ;;  %v1083_v4 = vadd.f32 %v1082_v58, %v1080_v57 }
  0x88   :  { %p1419_p13 = por %p1418_p12, %p1417_p11 }
  0x8a   :  { %p1420_p0 = pnand %p1419_p13, %p1413_p10 }
  0xb8   :  { %v546_v39 = vpop.permute.xlu1 %545  ;;  %v431_v42 = vpop.permute.xlu0 %430 }
  0xb9   :  { %v547_v44 = vrot.slane %v546_v39, 2  ;;  %v432_v45 = vrot.slane %v431_v42, 2 }
  0xbb   :  { %v548_v49 = vsel %vm425_vm5, %v546_v39, %v547_v44  ;;  %v433_v50 = vsel %vm425_vm5, %v431_v42, %v432_v45 }
  0xbc   :  { %v550_v51 = vadd.f32 %v548_v49, %v516_v41  ;;  %v435_v52 = vadd.f32 %v433_v50, %v398_v43  ;;  %v1818_v53 = vpop.permute.xlu1 %552  ;;  %v438_v54 = vpop.permute.xlu0 %437 }
  0xbd   :  { %v439_v28 = vrot.slane %v438_v54, 2 }
  0xbe   :  { %559 = vrot.lane.b32.xlu0 %v550_v51, %s1445_s16  ;;  %444 = vrot.lane.b32.xlu1 %v435_v52, %s1445_s16 }
  0xbf   :  { %v440_v37 = vsel %vm425_vm5, %v438_v54, %v439_v28 }
  0xc0   :  { %v666_v60 = vpop.permute.xlu1 %665  ;;  %v659_v62 = vpop.permute.xlu0 %658  ;;  %v442_v49 = vadd.f32 %v440_v37, %v1752_v40 }
  0xc1   :  { %v660_v3 = vrot.slane %v659_v62, 2  ;;  %v667_v39 = vrot.slane %v666_v60, 2 }
  0xc3   :  { %v661_v7 = vsel %vm425_vm5, %v659_v62, %v660_v3  ;;  %v668_v50 = vsel %vm425_vm5, %v666_v60, %v667_v39  ;;  %v554_v62 = vrot.slane %v1818_v53, 2 }
  0xc4   :  { %v663_v8 = vadd.f32 %v661_v7, %v629_v61  ;;  %v1828_v9 = vpop.permute.xlu1 %893  ;;  %v887_v12 = vpop.permute.xlu0 %886  ;;  %v670_v63 = vadd.f32 %v668_v50, %v1765_v48 }
  0xc5   :  { %v888_v15 = vrot.slane %v887_v12, 6  ;;  %v555_v13 = vsel %vm425_vm5, %v1818_v53, %v554_v62  ;;  %v895_v14 = vrot.slane %v1828_v9, 2 }
  0xc6   :  { %672 = vrot.lane.b32.xlu1 %v663_v8, %s1445_s16 }
  0xc7   :  { %v889_v18 = vsel %vm425_vm5, %v888_v15, %v887_v12  ;;  %v896_v28 = vsel %vm425_vm5, %v1828_v9, %v895_v14 }
  0xc8   :  { %v891_v19 = vadd.f32 %v889_v18, %v857_v10  ;;  %v1007_v20 = vpop.permute.xlu1 %1006  ;;  %v1000_v23 = vpop.permute.xlu0 %999 }
  0xc9   :  { %v1001_v26 = vrot.slane %v1000_v23, 6  ;;  %v1008_v51 = vrot.slane %v1007_v20, 2 }
  0xca   :  { %900 = vrot.lane.b32.xlu0 %v891_v19, %s1445_s16 }
  0xcb   :  { %v1002_v32 = vsel %vm425_vm5, %v1001_v26, %v1000_v23  ;;  %v1009_v40 = vsel %vm425_vm5, %v1007_v20, %v1008_v51 }
  0xcc   :  { %v1004_v33 = vadd.f32 %v1002_v32, %v970_v22  ;;  %v781_v34 = vpop.permute.xlu1 %780  ;;  %v774_v36 = vpop.permute.xlu0 %773  ;;  %v1011_v48 = vadd.f32 %v1009_v40, %v1792_v11  ;;  %v557_v11 = vadd.f32 %v555_v13, %v1744_v29  ;;  %v898_v29 = vadd.f32 %v896_v28, %v1783_v0 }
  0xcd   :  { %v775_v38 = vrot.slane %v774_v36, 6  ;;  %v782_v60 = vrot.slane %v781_v34, 2 }
  0xce   :  { %1013 = vrot.lane.b32.xlu1 %v1004_v33, %s1445_s16 }
  0xcf   :  { %v776_v41 = vsel %vm425_vm5, %v775_v38, %v774_v36  ;;  %v783_v15 = vsel %vm425_vm5, %v781_v34, %v782_v60 }
  0xd0   :  { %v778_v42 = vadd.f32 %v776_v41, %v742_v31  ;;  %v567_v43 = vpop.permute.xlu1 %566  ;;  %v453_v44 = vpop.permute.xlu0 %452  ;;  %v785_v26 = vadd.f32 %v783_v15, %v1802_v21 }
  0xd1   :  { %v454_v45 = vrot.slane %v453_v44, 2  ;;  %v568_v8 = vrot.slane %v567_v43, 2 }
  0xd2   :  { %787 = vrot.lane.b32.xlu1 %v778_v42, %s1445_s16 }
  0xd3   :  { %v455_v52 = vsel %vm447_vm6, %v453_v44, %v454_v45  ;;  %v569_v23 = vsel %vm447_vm6, %v567_v43, %v568_v8  ;;  %v958_v8 = vstv %s1893_s24 }
  0xd4   :  { %v457_v54 = vadd.f32 %v455_v52, %v442_v49  ;;  %v908_v55 = vpop.permute.xlu1 %907  ;;  %v680_v56 = vpop.permute.xlu0 %679  ;;  %v571_v33 = vadd.f32 %v569_v23, %v557_v11  ;;  %v386_v49 = vstv %s1299_s19  ;;  %v845_v23 = vstv %s1901_s26 }
  0xd5   :  { %v681_v61 = vrot.slane %v680_v56, 2  ;;  %v909_v24 = vrot.slane %v908_v55, 2  ;;  %v387_v50 = vmul.f32 %v386_v49, %v1562_v35 }
  0xd6   :  { %459 = vrot.lane.b32.xlu0 %v457_v54, %s1446_s18 }
  0xd7   :  { %v682_v1 = vsel %vm447_vm6, %v680_v56, %v681_v61  ;;  %v910_v36 = vsel %vm447_vm6, %v908_v55, %v909_v24  ;;  %v615_v55 = vstv %s1252_s1  ;;  %v617_v56 = vstv %s1301_s20 }
  0xd8   :  { %v684_v3 = vadd.f32 %v682_v1, %v670_v63  ;;  %v1113_v6 = vpop.permute.xlu1 %1112  ;;  %v1021_v7 = vpop.permute.xlu0 %1020  ;;  %v912_v21 = vadd.f32 %v910_v36, %v898_v29  ;;  %v616_v61 = vmul.f32 %v615_v55, %v1553_v30  ;;  %v618_v62 = vmul.f32 %v617_v56, %v1562_v35 }
  0xd9   :  { %v1114_v10 = vrot.slane %v1113_v6, 6  ;;  %v1022_v12 = vrot.slane %v1021_v7, 2 }
  0xda   :  { %686 = vrot.lane.b32.xlu0 %v684_v3, %s1446_s18  ;;  %v502_v3 = vstv %s1885_s21 }
  0xdb   :  { %v1115_v16 = vsel %vm425_vm5, %v1114_v10, %v1113_v6  ;;  %v1023_v17 = vsel %vm447_vm6, %v1021_v7, %v1022_v12  ;;  %v504_v6 = vstv %s1889_s22  ;;  %v956_v7 = vstv %s1891_s23 }
  0xdc   :  { %v1117_v18 = vadd.f32 %v1115_v16, %v1083_v4  ;;  %v1025_v19 = vadd.f32 %v1023_v17, %v1011_v48  ;;  %v795_v20 = vpop.permute.xlu1 %794  ;;  %v1120_v22 = vpop.permute.xlu0 %1119  ;;  %v619_v12 = vadd.f32 %v618_v62, %v616_v61  ;;  %v503_v48 = vmul.f32 %v502_v3, %v1553_v30 }
  0xdd   :  { %v796_v53 = vrot.slane %v795_v20, 2  ;;  %v1121_v25 = vrot.slane %v1120_v22, 2  ;;  %v505_v17 = vmul.f32 %v504_v6, %v1562_v35 }
  0xde   :  { %1027 = vrot.lane.b32.xlu0 %v1025_v19, %s1446_s18  ;;  %1126 = vrot.lane.b32.xlu1 %v1117_v18, %s1445_s16  ;;  %s251_s16 = sld [smem:[#allocation8]]  ;;  %v957_v18 = vmul.f32 %v956_v7, %v1553_v30  ;;  %v959_v19 = vmul.f32 %v958_v8, %v1562_v35 }
  0xdf   :  { %v797_v32 = vsel %vm447_vm6, %v795_v20, %v796_v53  ;;  %v1122_v38 = vsel %vm425_vm5, %v1120_v22, %v1121_v25  ;;  %v843_v22 = vstv %s1897_s25 }
  0xe0   :  { %v799_v34 = vadd.f32 %v797_v32, %v785_v26  ;;  %v1134_v31 = vpop.permute.xlu0 %1133  ;;  %v1124_v39 = vadd.f32 %v1122_v38, %v1807_v27  ;;  %v423_v43 = vpop.permute.xlu1 %422  ;;  %v960_v36 = vadd.f32 %v959_v19, %v957_v18 }
  0xe1   :  { %v1135_v37 = vrot.slane %v1134_v31, 2  ;;  %v424_v54 = vrot.slane %v423_v43, 2 }
  0xe2   :  { %801 = vrot.lane.b32.xlu0 %v799_v34, %s1446_s18  ;;  %573 = vrot.lane.b32.xlu1 %v571_v33, %s1446_s18  ;;  %v844_v34 = vmul.f32 %v843_v22, %v1553_v30 }
  0xe3   :  { %v1136_v9 = vsel %vm447_vm6, %v1134_v31, %v1135_v37  ;;  %v426_v40 = vsel %vm425_vm5, %v423_v43, %v424_v54  ;;  %v846_v31 = vmul.f32 %v845_v23, %v1562_v35 }
  0xe4   :  { %v1138_v41 = vadd.f32 %v1136_v9, %v1124_v39  ;;  %v1877_v42 = vpop.permute.xlu0 %538  ;;  %v652_v0 = vpop.permute.xlu1 %651  ;;  %v384_v47 = vstv %s251_s16  ;;  %v728_v39 = vstv %s1910_s27 }
  0xe5   :  { %v385_v51 = vmul.f32 %v384_v47, %v1553_v30  ;;  %v653_v60 = vrot.slane %v652_v0, 2  ;;  %v540_v25 = vrot.slane %v1877_v42, 2  ;;  %v847_v54 = vadd.f32 %v846_v31, %v844_v34 }
  0xe6   :  { %914 = vrot.lane.b32.xlu1 %v912_v21, %s1446_s18  ;;  %v506_v21 = vadd.f32 %v505_v17, %v503_v48  ;;  %v729_v55 = vmul.f32 %v728_v39, %v1553_v30 }
  0xe7   :  { %v388_v58 = vadd.f32 %v387_v50, %v385_v51  ;;  %v654_v14 = vsel %vm425_vm5, %v652_v0, %v653_v60  ;;  %v541_v43 = vsel %vm425_vm5, %v1877_v42, %v540_v25  ;;  %v730_v0 = vstv %s1914_s28 }
  0xe8   :  { %v1879_v44 = vpop.permute.xlu0 %879  ;;  %v1883_v27 = vpop.permute.xlu1 %992  ;;  %v656_v11 = vadd.f32 %v654_v14, %v619_v12  ;;  %v731_v62 = vmul.f32 %v730_v0, %v1562_v35 }
  0xe9   :  { %v428_v10 = vadd.f32 %v426_v40, %v388_v58  ;;  %v994_v24 = vrot.slane %v1883_v27, 2  ;;  %v881_v50 = vrot.slane %v1879_v44, 2  ;;  %v1071_v40 = vstv %s1926_s30 }
  0xea   :  { %1140 = vrot.lane.b32.xlu1 %v1138_v41, %s1446_s18  ;;  %v1072_v14 = vmul.f32 %v1071_v40, %v1562_v35 }
  0xeb   :  { %v995_v9 = vsel %vm425_vm5, %v1883_v27, %v994_v24  ;;  %v882_v8 = vsel %vm425_vm5, %v1879_v44, %v881_v50  ;;  %v732_v44 = vadd.f32 %v731_v62, %v729_v55 }
  0xec   :  { %v1881_v45 = vpop.permute.xlu0 %766  ;;  %v997_v42 = vadd.f32 %v995_v9, %v960_v36 }
  0xed   :  { %v768_v3 = vrot.slane %v1881_v45, 2 }
  0xef   :  { %v769_v22 = vsel %vm425_vm5, %v1881_v45, %v768_v3 }
  0xf0   :  { %v1887_v46 = vpop.permute.xlu0 %1105  ;;  %v771_v34 = vadd.f32 %v769_v22, %v732_v44  ;;  %v350_v22 = vand.u32 127, %v116_v2 }
  0xf1   :  { %v1107_v18 = vrot.slane %v1887_v46, 2 }
  0xf3   :  { %v1108_v45 = vsel %vm425_vm5, %v1887_v46, %v1107_v18 }
 0x130   :  { %v445_v52 = vpop.permute.xlu1 %444  ;;  %v1899_v57 = vpop.permute.xlu0 %559 }
 0x131   :  { %v446_v1 = vrot.slane %v445_v52, 2  ;;  %v561_v51 = vrot.slane %v1899_v57, 2 }
 0x133   :  { %v448_v15 = vsel %vm447_vm6, %v445_v52, %v446_v1  ;;  %v543_v1 = vadd.f32 %v541_v43, %v506_v21 }
 0x134   :  { %v450_v26 = vadd.f32 %v448_v15, %v428_v10  ;;  %v562_v10 = vsel %vm447_vm6, %v1899_v57, %v561_v51 }
 0x138   :  { %v673_v63 = vpop.permute.xlu1 %672 }
 0x139   :  { %v674_v16 = vrot.slane %v673_v63, 2 }
 0x13b   :  { %v675_v28 = vsel %vm447_vm6, %v673_v63, %v674_v16  ;;  %v1069_v63 = vstv %s1920_s29 }
 0x13c   :  { %v1907_v4 = vpop.permute.xlu0 %900  ;;  %v677_v47 = vadd.f32 %v675_v28, %v656_v11  ;;  %v1070_v48 = vmul.f32 %v1069_v63, %v1553_v30  ;;  %v564_v30 = vadd.f32 %v562_v10, %v543_v1 }
 0x13d   :  { %v902_v12 = vrot.slane %v1907_v4, 2 }
 0x13e   :  { %v1073_v11 = vadd.f32 %v1072_v14, %v1070_v48 }
 0x13f   :  { %v903_v23 = vsel %vm447_vm6, %v1907_v4, %v902_v12 }
 0x140   :  { %v1014_v13 = vpop.permute.xlu1 %1013  ;;  %v1110_v39 = vadd.f32 %v1108_v45, %v1073_v11 }
 0x141   :  { %v1015_v32 = vrot.slane %v1014_v13, 2 }
 0x143   :  { %v1016_v52 = vsel %vm447_vm6, %v1014_v13, %v1015_v32 }
 0x144   :  { %v788_v38 = vpop.permute.xlu1 %787  ;;  %v1018_v6 = vadd.f32 %v1016_v52, %v997_v42 }
 0x145   :  { %v789_v57 = vrot.slane %v788_v38, 2 }
 0x147   :  { %v790_v32 = vsel %vm447_vm6, %v788_v38, %v789_v57 }
 0x148   :  { %v460_v20 = vpop.permute.xlu0 %459  ;;  %v792_v9 = vadd.f32 %v790_v32, %v771_v34 }
 0x149   :  { %v461_v53 = vrot.slane %v460_v20, 6 }
 0x14b   :  { %v463_v33 = vsel %vm462_vm7, %v461_v53, %v460_v20  ;;  %v884_v20 = vadd.f32 %v882_v8, %v847_v54 }
 0x14c   :  { %v1934_v37 = vadd.f32 %v463_v33, %v450_v26  ;;  %v687_v29 = vpop.permute.xlu0 %686 }
 0x14d   :  { %v688_v41 = vrot.slane %v687_v29, 6  ;;  %v905_v31 = vadd.f32 %v903_v23, %v884_v20  ;;  %v351_v23 = vadd.s32 128, %v350_v22 }
 0x14e   :  { %v1944_v49 = vrot.slane %v1934_v37, %v1505_v5  ;;  %v467_v52 = vcombine.high %v1934_v37, %v1934_v37 }
 0x14f   :  { %v689_v27 = vsel %vm462_vm7, %v688_v41, %v687_v29 }
 0x150   :  { %v1951_v56 = vadd.f32 %v689_v27, %v677_v47  ;;  %v1028_v58 = vpop.permute.xlu0 %1027  ;;  %v1127_v61 = vpop.permute.xlu1 %1126  ;;  %483 = vrot.lane.b32.xlu0 %v1944_v49, %s1447_s3  ;;  %v482_v42 = vcombine.high %v1944_v49, %v1944_v49 }
 0x151   :  { %v1029_v60 = vrot.slane %v1028_v58, 6  ;;  %v1128_v24 = vrot.slane %v1127_v61, 2 }
 0x152   :  { %v1961_v7 = vrot.slane %v1951_v56, %v1505_v5  ;;  %v693_v37 = vcombine.high %v1951_v56, %v1951_v56 }
 0x153   :  { %v1030_v13 = vsel %vm462_vm7, %v1029_v60, %v1028_v58  ;;  %v1129_v36 = vsel %vm447_vm6, %v1127_v61, %v1128_v24  ;;  %v481_v58 = vrot.slane %v467_v52, %v1505_v5 }
 0x154   :  { %v1971_v15 = vadd.f32 %v1030_v13, %v1018_v6  ;;  %v802_v16 = vpop.permute.xlu0 %801  ;;  %v574_v17 = vpop.permute.xlu1 %573  ;;  %709 = vrot.lane.b32.xlu0 %v1961_v7, %s1448_s4  ;;  %v1131_v0 = vadd.f32 %v1129_v36, %v1110_v39  ;;  %v708_v40 = vcombine.high %v1961_v7, %v1961_v7  ;;  %v707_v49 = vrot.slane %v693_v37, %v1505_v5 }
 0x155   :  { %v575_v19 = vrot.slane %v574_v17, 6  ;;  %v803_v53 = vrot.slane %v802_v16, 6 }
 0x156   :  { %v1980_v35 = vrot.slane %v1971_v15, %v1505_v5  ;;  %v1034_v60 = vcombine.high %v1971_v15, %v1971_v15 }
 0x157   :  { %v576_v25 = vsel %vm462_vm7, %v575_v19, %v574_v17  ;;  %v804_v29 = vsel %vm462_vm7, %v803_v53, %v802_v16  ;;  %v356_v53 = vand.u32 15, %v350_v22 }
 0x158   :  { %v578_v26 = vadd.f32 %v576_v25, %v564_v30  ;;  %v915_v28 = vpop.permute.xlu1 %914  ;;  %1050 = vrot.lane.b32.xlu0 %v1980_v35, %s1449_s5  ;;  %v806_v38 = vadd.f32 %v804_v29, %v792_v9  ;;  %v1049_v6 = vcombine.high %v1980_v35, %v1980_v35  ;;  %v1048_v7 = vrot.slane %v1034_v60, %v1505_v5 }
 0x159   :  { %v916_v33 = vrot.slane %v915_v28, 6  ;;  %v363_v25 = vand.u32 15, %v351_v23  ;;  %vm496_vm11 = vcmp.ge.s32.totalorder %v356_v53, 2  ;;  %vm609_vm14 = vcmp.ge.s32.totalorder %v356_v53, 1 }
 0x15a   :  { %v587_v4 = vrot.slane %v578_v26, %v1505_v5  ;;  %v815_v27 = vrot.slane %v806_v38, %v1505_v5  ;;  %v580_v55 = vcombine.high %v578_v26, %v578_v26  ;;  %v808_v3 = vcombine.high %v806_v38, %v806_v38 }
 0x15b   :  { %v917_v21 = vsel %vm462_vm7, %v916_v33, %v915_v28  ;;  %vm497_vm13 = vcmp.ge.s32.totalorder %v363_v25, 2  ;;  %vm610_vm0 = vcmp.ge.s32.totalorder %v363_v25, 1  ;;  %vm952_vm5 = vcmp.lt.s32.totalorder %v356_v53, 14 }
 0x15c   :  { %v919_v41 = vadd.f32 %v917_v21, %v905_v31  ;;  %596 = vrot.lane.b32.xlu1 %v587_v4, %s1450_s6  ;;  %v1141_v43 = vpop.permute.xlu1 %1140  ;;  %v594_v61 = vrot.slane %v580_v55, %v1505_v5  ;;  %v595_v62 = vcombine.high %v587_v4, %v587_v4  ;;  %v822_v10 = vrot.slane %v808_v3, %v1505_v5 }
 0x15d   :  { %v1142_v46 = vrot.slane %v1141_v43, 6  ;;  %v823_v12 = vcombine.high %v815_v27, %v815_v27  ;;  %vm953_vm6 = vcmp.lt.s32.totalorder %v363_v25, 14  ;;  %vm1065_vm8 = vcmp.lt.s32.totalorder %v356_v53, 13 }
 0x15e   :  { %v928_v47 = vrot.slane %v919_v41, %v1505_v5  ;;  %v921_v63 = vcombine.high %v919_v41, %v919_v41  ;;  %vm1066_vm10 = vcmp.lt.s32.totalorder %v363_v25, 13 }
 0x15f   :  { %v1143_v50 = vsel %vm462_vm7, %v1142_v46, %v1141_v43  ;;  %vm830_vm7 = vcmask 392192  }
 0x160   :  { %v1145_v51 = vadd.f32 %v1143_v50, %v1131_v0  ;;  %937 = vrot.lane.b32.xlu1 %v928_v47, %s1451_s7  ;;  %v935_v56 = vrot.slane %v921_v63, %v1505_v5  ;;  %v936_v1 = vcombine.high %v928_v47, %v928_v47 }
 0x162   :  { %v1154_v54 = vrot.slane %v1145_v51, %v1505_v5  ;;  %v1147_v8 = vcombine.high %v1145_v51, %v1145_v51 }
 0x164   :  { %824 = vrot.lane.b32.xlu1 %v815_v27, %s1452_s8  ;;  %1163 = vrot.lane.b32.xlu0 %v1154_v54, %s1453_s9  ;;  %v1162_v13 = vcombine.high %v1154_v54, %v1154_v54  ;;  %v1161_v48 = vrot.slane %v1147_v8, %v1505_v5 }
 0x168   :  { %485 = vrot.lane.b32.xlu1 %v482_v42, %s1447_s3  ;;  %487 = vrot.lane.b32.xlu0 %v481_v58, %s1447_s3 }
 0x16c   :  { %600 = vrot.lane.b32.xlu1 %v594_v61, %s1450_s6  ;;  %598 = vrot.lane.b32.xlu0 %v595_v62, %s1450_s6 }
 0x170   :  { %711 = vrot.lane.b32.xlu1 %v708_v40, %s1448_s4  ;;  %713 = vrot.lane.b32.xlu0 %v707_v49, %s1448_s4 }
 0x174   :  { %941 = vrot.lane.b32.xlu1 %v935_v56, %s1451_s7  ;;  %939 = vrot.lane.b32.xlu0 %v936_v1, %s1451_s7 }
 0x178   :  { %1052 = vrot.lane.b32.xlu1 %v1049_v6, %s1449_s5  ;;  %1054 = vrot.lane.b32.xlu0 %v1048_v7, %s1449_s5 }
 0x17c   :  { %828 = vrot.lane.b32.xlu1 %v822_v10, %s1452_s8  ;;  %826 = vrot.lane.b32.xlu0 %v823_v12, %s1452_s8 }
 0x180   :  { %1165 = vrot.lane.b32.xlu1 %v1162_v13, %s1453_s9  ;;  %1167 = vrot.lane.b32.xlu0 %v1161_v48, %s1453_s9 }
 0x1c2   :  { %v484_v14 = vpop.permute.xlu0 %483 }
 0x1c6   :  { %v710_v15 = vpop.permute.xlu0 %709 }
 0x1ca   :  { %v1051_v17 = vpop.permute.xlu0 %1050 }
 0x1ce   :  { %v597_v16 = vpop.permute.xlu1 %596 }
 0x1d2   :  { %v938_v44 = vpop.permute.xlu1 %937 }
 0x1d6   :  { %v825_v18 = vpop.permute.xlu1 %824  ;;  %v2029_v57 = vpop.permute.xlu0 %1163 }
 0x1da   :  { %v486_v19 = vpop.permute.xlu1 %485  ;;  %v488_v20 = vpop.permute.xlu0 %487 }
 0x1db   :  { %v490_v29 = vsel %vm2063_vm1, %v484_v14, %v486_v19  ;;  %v491_v21 = vsel %vm2064_vm2, %v486_v19, %v488_v20  ;;  %v1454_v19 = vmov 1966171168  }
 0x1dc   :  { %v1204_v20 = vunpack.c.l.s4 %v1454_v19 }
 0x1de   :  { %v601_v30 = vpop.permute.xlu1 %600  ;;  %v599_v35 = vpop.permute.xlu0 %598  ;;  %v1205_v22 = vunpack.c.0.s8 %v1204_v20 }
 0x1df   :  { %v603_v32 = vsel %vm602_vm12, %v597_v16, %v599_v35  ;;  %v604_v33 = vsel %vm602_vm12, %v599_v35, %v601_v30  ;;  %vm2066_vm12 = vcmp.ge.s32.totalorder %v363_v25, 3 }
 0x1e0   :  { %v607_v39 = vsel %vm496_vm11, %v603_v32, 0.0  ;;  %v608_v9 = vsel %vm497_vm13, %v604_v33, 0.0  ;;  %vm2065_vm11 = vcmp.ge.s32.totalorder %v356_v53, 3  ;;  %v495_v55 = vsel %vm2066_vm12, %v491_v21, 0.0 }
 0x1e1   :  { %v494_v54 = vsel %vm2065_vm11, %v490_v29, 0.0  ;;  %v1177_v61 = vadd.f32 %v608_v9, %v495_v55  ;;  %vm2067_vm13 = vcmp.lt.s32.totalorder %v356_v53, 15  ;;  %v1208_v35 = vsub.s32 %v1205_v22, %v1494_v59 }
 0x1e2   :  { %v712_v5 = vpop.permute.xlu1 %711  ;;  %v714_v24 = vpop.permute.xlu0 %713  ;;  %v1176_v37 = vadd.f32 %v607_v39, %v494_v54 }
 0x1e3   :  { %v716_v34 = vsel %vm715_vm15, %v710_v15, %v712_v5  ;;  %v717_v31 = vsel %vm715_vm15, %v712_v5, %v714_v24  ;;  %vm2068_vm15 = vcmp.lt.s32.totalorder %v363_v25, 15 }
 0x1e4   :  { %v720_v50 = vsel %vm609_vm14, %v716_v34, 0.0  ;;  %v721_v51 = vsel %vm610_vm0, %v717_v31, 0.0 }
 0x1e6   :  { %v942_v11 = vpop.permute.xlu1 %941  ;;  %v940_v26 = vpop.permute.xlu0 %939 }
 0x1e7   :  { %v944_v46 = vsel %vm943_vm3, %v938_v44, %v940_v26  ;;  %v945_v0 = vsel %vm943_vm3, %v940_v26, %v942_v11 }
 0x1e8   :  { %v948_v62 = vsel %vm2067_vm13, %v944_v46, 0.0  ;;  %v949_v63 = vsel %vm2068_vm15, %v945_v0, 0.0 }
 0x1ea   :  { %v1053_v28 = vpop.permute.xlu1 %1052  ;;  %v1055_v45 = vpop.permute.xlu0 %1054 }
 0x1eb   :  { %v1057_v4 = vsel %vm1056_vm4, %v1051_v17, %v1053_v28  ;;  %v1058_v36 = vsel %vm1056_vm4, %v1053_v28, %v1055_v45 }
 0x1ec   :  { %v1061_v52 = vsel %vm952_vm5, %v1057_v4, 0.0  ;;  %v1062_v27 = vsel %vm953_vm6, %v1058_v36, 0.0 }
 0x1ed   :  { %v1180_v60 = vadd.f32 %v1061_v52, %v948_v62  ;;  %v1181_v56 = vadd.f32 %v1062_v27, %v949_v63 }
 0x1ee   :  { %v829_v41 = vpop.permute.xlu1 %828  ;;  %v827_v43 = vpop.permute.xlu0 %826 }
 0x1ef   :  { %v831_v38 = vsel %vm830_vm7, %v825_v18, %v827_v43  ;;  %v832_v47 = vsel %vm830_vm7, %v827_v43, %v829_v41 }
 0x1f0   :  { %v1178_v42 = vadd.f32 %v831_v38, %v720_v50  ;;  %v1179_v58 = vadd.f32 %v832_v47, %v721_v51 }
 0x1f2   :  { %v1166_v40 = vpop.permute.xlu1 %1165  ;;  %v1168_v49 = vpop.permute.xlu0 %1167  ;;  %v1182_v8 = vadd.f32 %v1178_v42, %v1176_v37  ;;  %v1183_v10 = vadd.f32 %v1179_v58, %v1177_v61 }
 0x1f3   :  { %v1170_v1 = vsel %vm1169_vm9, %v2029_v57, %v1166_v40  ;;  %v1171_v3 = vsel %vm1169_vm9, %v1166_v40, %v1168_v49 }
 0x1f4   :  { %v1174_v6 = vsel %vm1065_vm8, %v1170_v1, 0.0  ;;  %v1175_v7 = vsel %vm1066_vm10, %v1171_v3, 0.0  ;;  %vm1229_vm8 = vcmp.lt.s32.totalorder %v116_v2, 256 }
 0x1f5   :  { %v1184_v12 = vadd.f32 %v1180_v60, %v1174_v6  ;;  %v1185_v13 = vadd.f32 %v1181_v56, %v1175_v7 }
 0x1f7   :  { %v1186_v48 = vadd.f32 %v1184_v12, %v1182_v8  ;;  %v1187_v14 = vadd.f32 %v1185_v13, %v1183_v10 }
 0x1f9   :  { %v1348_v15 = vmul.f32 -1.442695, %v1186_v48  ;;  %v1349_v16 = vmul.f32 -1.442695, %v1187_v14 }
 0x1fb   :  { %1372 = vpow2.f32 %v1348_v15 }
 0x1fc   :  { %1374 = vpow2.f32 %v1349_v16 }
 0x208   :  { %v1373_v17 = vpop.eup %1372 }
 0x209   :  { %v1375_v44 = vpop.eup %1374  ;;  %v1194_v18 = vadd.f32 1.0, %v1373_v17 }
 0x20a   :  { %v1195_v57 = vadd.f32 1.0, %v1375_v44 }
 0x20b   :  { %1376 = vrcp.f32 %v1194_v18 }
 0x20c   :  { %1378 = vrcp.f32 %v1195_v57 }
 0x218   :  { %v1377_v30 = vpop.eup %1376 }
 0x219   :  { %v1379_v23 = vpop.eup %1378 }
 0x21a   :  { %v1202_v5 = vcombine.low %v1377_v30, %v1379_v23 }
 0x21c   :  { %v1209_v24 = vrot.slane %v1202_v5, %v1208_v35 }
 0x21e   :  { %v1210_v53 = vcombine.high %v1209_v24, %v1209_v24  ;;  %v1217_v25 = vrot.slane %v1209_v24, %v1208_v35 }
 0x220   :  { %v1224_v11 = vrot.slane %v1210_v53, %v1208_v35  ;;  %1231 = vst.msk [vmem:[#allocation9] sm:$0x3] %vm1229_vm8, %v1217_v25 }
 0x222   :  { %1232 = vst.msk [vmem:[#allocation9 + $0x2] sm:$0x3] %vm1229_vm8, %v1224_v11 }
 0x223   :  { %1423 = shalt.err (!%p1420_p0)
}
 0x224   :  { %s1456_s12 = smov 32   ;;  %s1457_s13 = smov 2  }
 0x225   :  { %1244 = dma.vmem_to_hbm [thread:$0]  %s1239_s0, 64, %s2062_s2, [#allocation6], %s1456_s12, %s1456_s12, %s1457_s13  }
 0x226   :  { %1436 = dma.done.wait [#allocation6], 64  }
 0x227   :  { %1437 = vsyncadd [#allocation6], 4294967232 }
 0x228   :  { %1248 = vsyncpa [#allocation5], 1 }
 0x229   :  { %1249 = vsyncpa [#allocation6], 1 }
 0x22a   :  { %1250 = vsyncpa [#allocation7], 1 }

</bundles_post_ra>
